<compile_context>
chip_gen: v7x
topology: tpu7x:2x2x1
jax: 0.10.0
libtpu: 0.0.40
codegen_flags: <defaults>
</compile_context>

<pallas_src>
import functools
import math

import numpy as np
import jax
import jax.numpy as jnp
from jax.experimental import pallas as pl
from jax.experimental.pallas import tpu as pltpu


def _round_up(a, b):
    return (a + b - 1) // b * b


def _pick_row_chunk(block_tokens, block_embed):
    # Bound the live top-k working set (~3 arrays of row_chunk x block_embed
    # f32/i32 values) to roughly the vreg file; row_chunk must divide the
    # token tile and be a multiple of 8 sublanes.
    budget = max(8, (8192 // max(block_embed, 1)) // 8 * 8)
    rc = 8
    for cand in range(8, block_tokens + 1, 8):
        if block_tokens % cand == 0 and cand <= budget:
            rc = cand
    return rc


# --------------------------------- kernel ------------------------------------

def query_topk_kernel(x_ref, w_ref, vals_ref, idx_ref, *, topk, row_chunk):
    """Grid = (token tiles [parallel], num_embed chunks [arbitrary]).

    Per step: logits_chunk = x_tile @ W^T[:, chunk]  (MXU, lane-dense), then
    merge the chunk's candidates into the running top-k held in the output
    block (resident in VMEM across the num_embed axis).
    """
    f32 = jnp.float32
    i32 = jnp.int32
    neg_inf = f32(-jnp.inf)
    big_idx = jnp.int32(np.iinfo(np.int32).max)

    j = pl.program_id(1)                       # num_embed chunk index
    nc = w_ref.shape[1]                        # block_embed
    bt = x_ref.shape[0]                        # block_tokens
    base = j * nc                              # global column offset of chunk

    # Running top-k lives in the output block; init once per token tile.
    @pl.when(j == 0)
    def _():
        vals_ref[...] = jnp.full(vals_ref.shape, -jnp.inf, vals_ref.dtype)
        idx_ref[...] = jnp.zeros(idx_ref.shape, idx_ref.dtype)

    lane0 = jax.lax.broadcasted_iota(i32, (row_chunk, nc), 1)
    w = w_ref[...]

    def row_body(c):
        r = c * row_chunk
        if not isinstance(r, int):
            r = pl.multiple_of(r, row_chunk)
        rows = pl.ds(r, row_chunk)

        logits = jnp.dot(x_ref[rows, :], w, preferred_element_type=f32)  # (rc, nc)
        lane = lane0 + base                                              # global idx

        prev_v = vals_ref[rows, :].astype(f32)   # (rc, K) running top-k (desc)
        prev_i = idx_ref[rows, :]                # (rc, K)

        chunk_w = logits
        prev_w = prev_v
        # topk is small & static: short unrolled selection loop.  Each step:
        # max over chunk + max over prev (cheap K-wide), lowest-index argmax,
        # blend (ties prefer prev == lower global index), store directly to
        # the output refs, mask the winner.
        for step in range(topk):
            mc = jnp.max(chunk_w, axis=1, keepdims=True)                 # (rc,1)
            mp = jnp.max(prev_w, axis=1, keepdims=True)                  # (rc,1)
            sc = jnp.min(jnp.where(chunk_w == mc, lane, big_idx),
                         axis=1, keepdims=True)
            sp = jnp.min(jnp.where(prev_w == mp, prev_i, big_idx),
                         axis=1, keepdims=True)
            take_prev = mp >= mc
            m = jnp.where(take_prev, mp, mc)
            sel = jnp.where(take_prev, sp, sc)
            vals_ref[rows, step:step + 1] = m.astype(vals_ref.dtype)
            idx_ref[rows, step:step + 1] = sel
            chunk_w = jnp.where(lane == sel, neg_inf, chunk_w)
            prev_w = jnp.where(prev_i == sel, neg_inf, prev_w)

    n_row_chunks = bt // row_chunk
    if n_row_chunks == 1:
        row_body(0)
    else:
        def body(c, carry):
            row_body(c)
            return carry
        jax.lax.fori_loop(0, n_row_chunks, body, 0,
                          unroll=bool(n_row_chunks <= 4))


# --------------------------------- wrapper -----------------------------------

def peer_lookup_query_unit_pallas(x, weight, *, topk,
                                  block_tokens=None, block_embed=None):
    """x: (..., emb_dim); weight: (num_embed, emb_dim) (PyTorch Linear layout).

    Returns (values, indices) of shape (..., topk), matching
    torch.topk(linear(x), k=topk, dim=-1) (values f32, indices int32).
    """
    lead = x.shape[:-1]
    emb_dim = x.shape[-1]
    num_embed = weight.shape[0]
    assert weight.shape[1] == emb_dim
    assert 0 < topk <= num_embed

    n_tok = int(np.prod(lead)) if lead else 1

    if block_tokens is None:
        block_tokens = min(256, _round_up(n_tok, 8))
    assert block_tokens % 8 == 0
    n_pad = _round_up(n_tok, block_tokens)

    if block_embed is None:
        if num_embed % 128 == 0:
            block_embed = 512
            while num_embed % block_embed:
                block_embed //= 2
        else:
            block_embed = num_embed
    assert num_embed % block_embed == 0
    assert block_embed == num_embed or block_embed % 128 == 0

    row_chunk = _pick_row_chunk(block_tokens, block_embed)

    x2d = x.reshape(n_tok, emb_dim)
    if n_pad != n_tok:
        x2d = jnp.pad(x2d, ((0, n_pad - n_tok), (0, 0)))
    # One-time layout op: lane-dense W^T.  In a real model keep the transposed
    # weight as the stored parameter so this never sits on the hot path.
    w_t = weight.T                                           # (emb_dim, num_embed)

    kernel = functools.partial(query_topk_kernel, topk=topk, row_chunk=row_chunk)

    itemsize = 4
    cost = pl.CostEstimate(
        flops=2 * n_pad * emb_dim * num_embed,
        transcendentals=0,
        bytes_accessed=(n_pad * emb_dim
                        + (n_pad // block_tokens) * emb_dim * num_embed
                        + 2 * n_pad * topk) * itemsize,
    )

    vals2d, idx2d = pl.pallas_call(
        kernel,
        out_shape=(jax.ShapeDtypeStruct((n_pad, topk), jnp.float32),
                   jax.ShapeDtypeStruct((n_pad, topk), jnp.int32)),
        grid_spec=pltpu.PrefetchScalarGridSpec(
            num_scalar_prefetch=0,
            grid=(n_pad // block_tokens, num_embed // block_embed),
            in_specs=[
                pl.BlockSpec((block_tokens, emb_dim), lambda i, j: (i, 0)),   # tokens
                pl.BlockSpec((emb_dim, block_embed), lambda i, j: (0, j)),    # W^T chunk
            ],
            out_specs=[
                pl.BlockSpec((block_tokens, topk), lambda i, j: (i, 0)),      # values
                pl.BlockSpec((block_tokens, topk), lambda i, j: (i, 0)),      # indices
            ],
        ),
        compiler_params=pltpu.CompilerParams(
            dimension_semantics=("parallel", "arbitrary"),
            vmem_limit_bytes=32 * 1024 * 1024),
        cost_estimate=cost,
    )(x2d, w_t)

    vals = vals2d[:n_tok].reshape(*lead, topk)
    idx = idx2d[:n_tok].reshape(*lead, topk)
    return vals, idx


# ----------------------------- plain-JAX reference ---------------------------

def peer_lookup_query_unit_ref(x, weight, *, topk):
    logits = x @ weight.T
    return jax.lax.top_k(logits, topk)


# ----------------------------------- main -------------------------------------

if __name__ == "__main__":
    # Small shapes consistent with PeerLookupQueryUnit(num_embed, emb_dim, topk).
    bs, seq = 2, 64
    emb_dim = 64
    num_embed = 256          # 2 lane-dense chunks of 128 -> exercises streaming merge
    topk = 4

    key = jax.random.PRNGKey(0)
    kw, kx = jax.random.split(key, 2)
    bound = 1.0 / math.sqrt(emb_dim)        # nn.Linear default init range
    weight = jax.random.uniform(kw, (num_embed, emb_dim), jnp.float32,
                                minval=-bound, maxval=bound)
    x = jax.random.normal(kx, (bs, seq, emb_dim), jnp.float32)

    vals, idx = peer_lookup_query_unit_pallas(
        x, weight, topk=topk, block_tokens=64, block_embed=128)  # grid (2, 2)
    vals = jax.block_until_ready(vals)
    idx = jax.block_until_ready(idx)

    rv, ri = peer_lookup_query_unit_ref(x, weight, topk=topk)
    rv = jax.block_until_ready(rv)
    ri = jax.block_until_ready(ri)

    v_np, i_np = np.asarray(vals), np.asarray(idx)
    rv_np, ri_np = np.asarray(rv), np.asarray(ri)

    assert v_np.shape == (bs, seq, topk) and i_np.shape == (bs, seq, topk)
    assert np.all(np.isfinite(v_np))
    assert np.all((i_np >= 0) & (i_np < num_embed))

    # Tolerant check: MXU vs XLA f32 rounding can flip a near-tie in top-k.
    val_close = np.abs(v_np - rv_np) <= (1e-2 + 1e-2 * np.abs(rv_np))
    idx_match = (i_np == ri_np)
    frac_val = float(np.mean(val_close))
    frac_idx = float(np.mean(idx_match))
    if frac_val < 0.98 or frac_idx < 0.98:
        raise AssertionError(
            f"kernel/reference mismatch: values close {frac_val:.4f}, "
            f"indices match {frac_idx:.4f}, "
            f"max|dv|={np.max(np.abs(v_np - rv_np)):.3e}")
    print("KERNEL_OK")
</pallas_src>

<mosaic_0001>
module attributes {stable_mosaic.version = 11 : i64} {
  func.func @query_topk_kernel(%arg0: i32, %arg1: i32, %arg2: memref<64x64xf32, #tpu.memory_space<vmem>>, %arg3: memref<64x128xf32, #tpu.memory_space<vmem>>, %arg4: memref<64x4xf32, #tpu.memory_space<vmem>>, %arg5: memref<64x4xi32, #tpu.memory_space<vmem>>) attributes {dimension_semantics = [#tpu.dimension_semantics<parallel>, #tpu.dimension_semantics<arbitrary>], iteration_bounds = array<i64: 2, 2>, scalar_prefetch = 0 : i64, scratch_operands = 0 : i64, tpu.core_type = #tpu.core_type<tc>, window_params = [{transform_indices = @transform_0, window_bounds = array<i64: 64, 64>}, {transform_indices = @transform_1, window_bounds = array<i64: 64, 128>}, {transform_indices = @transform_2, window_bounds = array<i64: 64, 4>}, {transform_indices = @transform_3, window_bounds = array<i64: 64, 4>}]} {
    %c128_i32 = arith.constant 128 : i32
    %0 = arith.muli %arg1, %c128_i32 : i32
    %c0_i32 = arith.constant 0 : i32
    %1 = arith.cmpi eq, %arg1, %c0_i32 : i32
    %2 = arith.extui %1 : i1 to i32
    %c0_i32_0 = arith.constant 0 : i32
    %3 = arith.cmpi ne, %2, %c0_i32_0 : i32
    scf.if %3 {
      %cst_50 = arith.constant 0xFF800000 : f32
      %120 = vector.broadcast %cst_50 : f32 to vector<64x4xf32>
      %c0_51 = arith.constant 0 : index
      %c0_52 = arith.constant 0 : index
      %121 = vector.load %arg4[%c0_51, %c0_52] : memref<64x4xf32, #tpu.memory_space<vmem>>, vector<64x4xf32>
      tpu.vector_store %arg4[%c0_51, %c0_52], %120 {strides = array<i32>} : memref<64x4xf32, #tpu.memory_space<vmem>>, vector<64x4xf32>,
      %c0_i32_53 = arith.constant 0 : i32
      %122 = vector.broadcast %c0_i32_53 : i32 to vector<64x4xi32>
      %c0_54 = arith.constant 0 : index
      %c0_55 = arith.constant 0 : index
      %123 = vector.load %arg5[%c0_54, %c0_55] : memref<64x4xi32, #tpu.memory_space<vmem>>, vector<64x4xi32>
      tpu.vector_store %arg5[%c0_54, %c0_55], %122 {strides = array<i32>} : memref<64x4xi32, #tpu.memory_space<vmem>>, vector<64x4xi32>,
    } else {
    }
    %4 = tpu.iota {dimensions = array<i32: 1>} : vector<64x128xi32>
    %c0 = arith.constant 0 : index
    %c0_1 = arith.constant 0 : index
    %5 = vector.load %arg3[%c0, %c0_1] : memref<64x128xf32, #tpu.memory_space<vmem>>, vector<64x128xf32>
    %c0_2 = arith.constant 0 : index
    %c0_3 = arith.constant 0 : index
    %6 = vector.load %arg2[%c0_2, %c0_3] : memref<64x64xf32, #tpu.memory_space<vmem>>, vector<64x64xf32>
    %cst = arith.constant dense<0.000000e+00> : vector<64x128xf32>
    %7 = tpu.matmul %6, %5, %cst {dimension_numbers = #tpu.dot_dimension_numbers<[1], [0], [0], [1], [0, 0, 1, 1], [], []>} : vector<64x64xf32>, vector<64x128xf32>, vector<64x128xf32> -> vector<64x128xf32>
    %8 = vector.broadcast %0 : i32 to vector<64x128xi32>
    %9 = arith.addi %4, %8 : vector<64x128xi32>
    %c0_4 = arith.constant 0 : index
    %c0_5 = arith.constant 0 : index
    %10 = vector.load %arg4[%c0_4, %c0_5] : memref<64x4xf32, #tpu.memory_space<vmem>>, vector<64x4xf32>
    %c0_6 = arith.constant 0 : index
    %c0_7 = arith.constant 0 : index
    %11 = vector.load %arg5[%c0_6, %c0_7] : memref<64x4xi32, #tpu.memory_space<vmem>>, vector<64x4xi32>
    %cst_8 = arith.constant dense<0xFF800000> : vector<64xf32>
    %12 = vector.multi_reduction <maximumf>, %7, %cst_8 [1] : vector<64x128xf32> to vector<64xf32>
    %13 = vector.shape_cast %12 : vector<64xf32> to vector<64x1xf32>
    %cst_9 = arith.constant dense<0xFF800000> : vector<64xf32>
    %14 = vector.multi_reduction <maximumf>, %10, %cst_9 [1] : vector<64x4xf32> to vector<64xf32>
    %15 = vector.shape_cast %14 : vector<64xf32> to vector<64x1xf32>
    %16 = vector.broadcast %13 : vector<64x1xf32> to vector<64x128xf32>
    %17 = arith.cmpf oeq, %7, %16 : vector<64x128xf32>
    %c2147483647_i32 = arith.constant 2147483647 : i32
    %18 = vector.broadcast %c2147483647_i32 : i32 to vector<64x128xi32>
    %19 = arith.select %17, %9, %18 : vector<64x128xi1>, vector<64x128xi32>
    %cst_10 = arith.constant dense<2147483647> : vector<64xi32>
    %20 = vector.multi_reduction <minsi>, %19, %cst_10 [1] : vector<64x128xi32> to vector<64xi32>
    %21 = vector.shape_cast %20 : vector<64xi32> to vector<64x1xi32>
    %22 = vector.broadcast %15 : vector<64x1xf32> to vector<64x4xf32>
    %23 = arith.cmpf oeq, %10, %22 : vector<64x4xf32>
    %c2147483647_i32_11 = arith.constant 2147483647 : i32
    %24 = vector.broadcast %c2147483647_i32_11 : i32 to vector<64x4xi32>
    %25 = arith.select %23, %11, %24 : vector<64x4xi1>, vector<64x4xi32>
    %cst_12 = arith.constant dense<2147483647> : vector<64xi32>
    %26 = vector.multi_reduction <minsi>, %25, %cst_12 [1] : vector<64x4xi32> to vector<64xi32>
    %27 = vector.shape_cast %26 : vector<64xi32> to vector<64x1xi32>
    %28 = arith.cmpf oge, %15, %13 : vector<64x1xf32>
    %29 = arith.select %28, %15, %13 : vector<64x1xi1>, vector<64x1xf32>
    %30 = arith.select %28, %27, %21 : vector<64x1xi1>, vector<64x1xi32>
    %c0_13 = arith.constant 0 : index
    %c0_14 = arith.constant 0 : index
    %31 = vector.load %arg4[%c0_13, %c0_14] : memref<64x4xf32, #tpu.memory_space<vmem>>, vector<64x1xf32>
    tpu.vector_store %arg4[%c0_13, %c0_14], %29 {strides = array<i32>} : memref<64x4xf32, #tpu.memory_space<vmem>>, vector<64x1xf32>,
    %c0_15 = arith.constant 0 : index
    %c0_16 = arith.constant 0 : index
    %32 = vector.load %arg5[%c0_15, %c0_16] : memref<64x4xi32, #tpu.memory_space<vmem>>, vector<64x1xi32>
    tpu.vector_store %arg5[%c0_15, %c0_16], %30 {strides = array<i32>} : memref<64x4xi32, #tpu.memory_space<vmem>>, vector<64x1xi32>,
    %33 = vector.broadcast %30 : vector<64x1xi32> to vector<64x128xi32>
    %34 = arith.cmpi eq, %9, %33 : vector<64x128xi32>
    %cst_17 = arith.constant 0xFF800000 : f32
    %35 = vector.broadcast %cst_17 : f32 to vector<64x128xf32>
    %36 = arith.select %34, %35, %7 : vector<64x128xi1>, vector<64x128xf32>
    %37 = vector.broadcast %30 : vector<64x1xi32> to vector<64x4xi32>
    %38 = arith.cmpi eq, %11, %37 : vector<64x4xi32>
    %cst_18 = arith.constant 0xFF800000 : f32
    %39 = vector.broadcast %cst_18 : f32 to vector<64x4xf32>
    %40 = arith.select %38, %39, %10 : vector<64x4xi1>, vector<64x4xf32>
    %cst_19 = arith.constant dense<0xFF800000> : vector<64xf32>
    %41 = vector.multi_reduction <maximumf>, %36, %cst_19 [1] : vector<64x128xf32> to vector<64xf32>
    %42 = vector.shape_cast %41 : vector<64xf32> to vector<64x1xf32>
    %cst_20 = arith.constant dense<0xFF800000> : vector<64xf32>
    %43 = vector.multi_reduction <maximumf>, %40, %cst_20 [1] : vector<64x4xf32> to vector<64xf32>
    %44 = vector.shape_cast %43 : vector<64xf32> to vector<64x1xf32>
    %45 = vector.broadcast %42 : vector<64x1xf32> to vector<64x128xf32>
    %46 = arith.cmpf oeq, %36, %45 : vector<64x128xf32>
    %c2147483647_i32_21 = arith.constant 2147483647 : i32
    %47 = vector.broadcast %c2147483647_i32_21 : i32 to vector<64x128xi32>
    %48 = arith.select %46, %9, %47 : vector<64x128xi1>, vector<64x128xi32>
    %cst_22 = arith.constant dense<2147483647> : vector<64xi32>
    %49 = vector.multi_reduction <minsi>, %48, %cst_22 [1] : vector<64x128xi32> to vector<64xi32>
    %50 = vector.shape_cast %49 : vector<64xi32> to vector<64x1xi32>
    %51 = vector.broadcast %44 : vector<64x1xf32> to vector<64x4xf32>
    %52 = arith.cmpf oeq, %40, %51 : vector<64x4xf32>
    %c2147483647_i32_23 = arith.constant 2147483647 : i32
    %53 = vector.broadcast %c2147483647_i32_23 : i32 to vector<64x4xi32>
    %54 = arith.select %52, %11, %53 : vector<64x4xi1>, vector<64x4xi32>
    %cst_24 = arith.constant dense<2147483647> : vector<64xi32>
    %55 = vector.multi_reduction <minsi>, %54, %cst_24 [1] : vector<64x4xi32> to vector<64xi32>
    %56 = vector.shape_cast %55 : vector<64xi32> to vector<64x1xi32>
    %57 = arith.cmpf oge, %44, %42 : vector<64x1xf32>
    %58 = arith.select %57, %44, %42 : vector<64x1xi1>, vector<64x1xf32>
    %59 = arith.select %57, %56, %50 : vector<64x1xi1>, vector<64x1xi32>
    %c0_25 = arith.constant 0 : index
    %c1 = arith.constant 1 : index
    %60 = vector.load %arg4[%c0_25, %c1] : memref<64x4xf32, #tpu.memory_space<vmem>>, vector<64x1xf32>
    tpu.vector_store %arg4[%c0_25, %c1], %58 {strides = array<i32>} : memref<64x4xf32, #tpu.memory_space<vmem>>, vector<64x1xf32>,
    %c0_26 = arith.constant 0 : index
    %c1_27 = arith.constant 1 : index
    %61 = vector.load %arg5[%c0_26, %c1_27] : memref<64x4xi32, #tpu.memory_space<vmem>>, vector<64x1xi32>
    tpu.vector_store %arg5[%c0_26, %c1_27], %59 {strides = array<i32>} : memref<64x4xi32, #tpu.memory_space<vmem>>, vector<64x1xi32>,
    %62 = vector.broadcast %59 : vector<64x1xi32> to vector<64x128xi32>
    %63 = arith.cmpi eq, %9, %62 : vector<64x128xi32>
    %cst_28 = arith.constant 0xFF800000 : f32
    %64 = vector.broadcast %cst_28 : f32 to vector<64x128xf32>
    %65 = arith.select %63, %64, %36 : vector<64x128xi1>, vector<64x128xf32>
    %66 = vector.broadcast %59 : vector<64x1xi32> to vector<64x4xi32>
    %67 = arith.cmpi eq, %11, %66 : vector<64x4xi32>
    %cst_29 = arith.constant 0xFF800000 : f32
    %68 = vector.broadcast %cst_29 : f32 to vector<64x4xf32>
    %69 = arith.select %67, %68, %40 : vector<64x4xi1>, vector<64x4xf32>
    %cst_30 = arith.constant dense<0xFF800000> : vector<64xf32>
    %70 = vector.multi_reduction <maximumf>, %65, %cst_30 [1] : vector<64x128xf32> to vector<64xf32>
    %71 = vector.shape_cast %70 : vector<64xf32> to vector<64x1xf32>
    %cst_31 = arith.constant dense<0xFF800000> : vector<64xf32>
    %72 = vector.multi_reduction <maximumf>, %69, %cst_31 [1] : vector<64x4xf32> to vector<64xf32>
    %73 = vector.shape_cast %72 : vector<64xf32> to vector<64x1xf32>
    %74 = vector.broadcast %71 : vector<64x1xf32> to vector<64x128xf32>
    %75 = arith.cmpf oeq, %65, %74 : vector<64x128xf32>
    %c2147483647_i32_32 = arith.constant 2147483647 : i32
    %76 = vector.broadcast %c2147483647_i32_32 : i32 to vector<64x128xi32>
    %77 = arith.select %75, %9, %76 : vector<64x128xi1>, vector<64x128xi32>
    %cst_33 = arith.constant dense<2147483647> : vector<64xi32>
    %78 = vector.multi_reduction <minsi>, %77, %cst_33 [1] : vector<64x128xi32> to vector<64xi32>
    %79 = vector.shape_cast %78 : vector<64xi32> to vector<64x1xi32>
    %80 = vector.broadcast %73 : vector<64x1xf32> to vector<64x4xf32>
    %81 = arith.cmpf oeq, %69, %80 : vector<64x4xf32>
    %c2147483647_i32_34 = arith.constant 2147483647 : i32
    %82 = vector.broadcast %c2147483647_i32_34 : i32 to vector<64x4xi32>
    %83 = arith.select %81, %11, %82 : vector<64x4xi1>, vector<64x4xi32>
    %cst_35 = arith.constant dense<2147483647> : vector<64xi32>
    %84 = vector.multi_reduction <minsi>, %83, %cst_35 [1] : vector<64x4xi32> to vector<64xi32>
    %85 = vector.shape_cast %84 : vector<64xi32> to vector<64x1xi32>
    %86 = arith.cmpf oge, %73, %71 : vector<64x1xf32>
    %87 = arith.select %86, %73, %71 : vector<64x1xi1>, vector<64x1xf32>
    %88 = arith.select %86, %85, %79 : vector<64x1xi1>, vector<64x1xi32>
    %c0_36 = arith.constant 0 : index
    %c2 = arith.constant 2 : index
    %89 = vector.load %arg4[%c0_36, %c2] : memref<64x4xf32, #tpu.memory_space<vmem>>, vector<64x1xf32>
    tpu.vector_store %arg4[%c0_36, %c2], %87 {strides = array<i32>} : memref<64x4xf32, #tpu.memory_space<vmem>>, vector<64x1xf32>,
    %c0_37 = arith.constant 0 : index
    %c2_38 = arith.constant 2 : index
    %90 = vector.load %arg5[%c0_37, %c2_38] : memref<64x4xi32, #tpu.memory_space<vmem>>, vector<64x1xi32>
    tpu.vector_store %arg5[%c0_37, %c2_38], %88 {strides = array<i32>} : memref<64x4xi32, #tpu.memory_space<vmem>>, vector<64x1xi32>,
    %91 = vector.broadcast %88 : vector<64x1xi32> to vector<64x128xi32>
    %92 = arith.cmpi eq, %9, %91 : vector<64x128xi32>
    %cst_39 = arith.constant 0xFF800000 : f32
    %93 = vector.broadcast %cst_39 : f32 to vector<64x128xf32>
    %94 = arith.select %92, %93, %65 : vector<64x128xi1>, vector<64x128xf32>
    %95 = vector.broadcast %88 : vector<64x1xi32> to vector<64x4xi32>
    %96 = arith.cmpi eq, %11, %95 : vector<64x4xi32>
    %cst_40 = arith.constant 0xFF800000 : f32
    %97 = vector.broadcast %cst_40 : f32 to vector<64x4xf32>
    %98 = arith.select %96, %97, %69 : vector<64x4xi1>, vector<64x4xf32>
    %cst_41 = arith.constant dense<0xFF800000> : vector<64xf32>
    %99 = vector.multi_reduction <maximumf>, %94, %cst_41 [1] : vector<64x128xf32> to vector<64xf32>
    %100 = vector.shape_cast %99 : vector<64xf32> to vector<64x1xf32>
    %cst_42 = arith.constant dense<0xFF800000> : vector<64xf32>
    %101 = vector.multi_reduction <maximumf>, %98, %cst_42 [1] : vector<64x4xf32> to vector<64xf32>
    %102 = vector.shape_cast %101 : vector<64xf32> to vector<64x1xf32>
    %103 = vector.broadcast %100 : vector<64x1xf32> to vector<64x128xf32>
    %104 = arith.cmpf oeq, %94, %103 : vector<64x128xf32>
    %c2147483647_i32_43 = arith.constant 2147483647 : i32
    %105 = vector.broadcast %c2147483647_i32_43 : i32 to vector<64x128xi32>
    %106 = arith.select %104, %9, %105 : vector<64x128xi1>, vector<64x128xi32>
    %cst_44 = arith.constant dense<2147483647> : vector<64xi32>
    %107 = vector.multi_reduction <minsi>, %106, %cst_44 [1] : vector<64x128xi32> to vector<64xi32>
    %108 = vector.shape_cast %107 : vector<64xi32> to vector<64x1xi32>
    %109 = vector.broadcast %102 : vector<64x1xf32> to vector<64x4xf32>
    %110 = arith.cmpf oeq, %98, %109 : vector<64x4xf32>
    %c2147483647_i32_45 = arith.constant 2147483647 : i32
    %111 = vector.broadcast %c2147483647_i32_45 : i32 to vector<64x4xi32>
    %112 = arith.select %110, %11, %111 : vector<64x4xi1>, vector<64x4xi32>
    %cst_46 = arith.constant dense<2147483647> : vector<64xi32>
    %113 = vector.multi_reduction <minsi>, %112, %cst_46 [1] : vector<64x4xi32> to vector<64xi32>
    %114 = vector.shape_cast %113 : vector<64xi32> to vector<64x1xi32>
    %115 = arith.cmpf oge, %102, %100 : vector<64x1xf32>
    %116 = arith.select %115, %102, %100 : vector<64x1xi1>, vector<64x1xf32>
    %117 = arith.select %115, %114, %108 : vector<64x1xi1>, vector<64x1xi32>
    %c0_47 = arith.constant 0 : index
    %c3 = arith.constant 3 : index
    %118 = vector.load %arg4[%c0_47, %c3] : memref<64x4xf32, #tpu.memory_space<vmem>>, vector<64x1xf32>
    tpu.vector_store %arg4[%c0_47, %c3], %116 {strides = array<i32>} : memref<64x4xf32, #tpu.memory_space<vmem>>, vector<64x1xf32>,
    %c0_48 = arith.constant 0 : index
    %c3_49 = arith.constant 3 : index
    %119 = vector.load %arg5[%c0_48, %c3_49] : memref<64x4xi32, #tpu.memory_space<vmem>>, vector<64x1xi32>
    tpu.vector_store %arg5[%c0_48, %c3_49], %117 {strides = array<i32>} : memref<64x4xi32, #tpu.memory_space<vmem>>, vector<64x1xi32>,
    return
  }
  func.func @transform_0(%arg0: i32, %arg1: i32) -> (i32, i32) {
    %c0_i32 = arith.constant 0 : i32
    %c0_i32_0 = arith.constant 0 : i32
    return %arg0, %c0_i32 : i32, i32
  }
  func.func @transform_1(%arg0: i32, %arg1: i32) -> (i32, i32) {
    %c0_i32 = arith.constant 0 : i32
    %c0_i32_0 = arith.constant 0 : i32
    return %c0_i32, %arg1 : i32, i32
  }
  func.func @transform_2(%arg0: i32, %arg1: i32) -> (i32, i32) {
    %c0_i32 = arith.constant 0 : i32
    %c0_i32_0 = arith.constant 0 : i32
    return %arg0, %c0_i32 : i32, i32
  }
  func.func @transform_3(%arg0: i32, %arg1: i32) -> (i32, i32) {
    %c0_i32 = arith.constant 0 : i32
    %c0_i32_0 = arith.constant 0 : i32
    return %arg0, %c0_i32 : i32, i32
  }
}

</mosaic_0001>

<bundles_post_ra>
// kernel: tpu_custom_call.1
= control target key start
LH: loop header
LB: loop body
LE: loop exit
PB: predicated region body
PF: predicated region fallthrough
CT: control target
= control target key end

     0   :  { %s2297_s12 = smov 0   ;;  %s2299_s13 = smov 0   ;;  %s4394_s0 = inlined_call_operand.vmem [shape: f32[128,64], index: 0, kind: input, shape index: {}]   ;;  %s4395_s1 = inlined_call_operand.vmem [shape: f32[64,256], index: 1, kind: input, shape index: {}]   ;;  %s4396_s2 = inlined_call_operand.vmem [shape: f32[128,4], index: 2, kind: output, shape index: {0}]   ;;  %s4397_s3 = inlined_call_operand.vmem [shape: s32[128,4], index: 3, kind: output, shape index: {1}]  }
   0x1   :  { %s2301_s14 = smov 0   ;;  %s2303_s15 = smov 0  }
   0x2   :  { %s2305_s16 = smov 0   ;;  %s2307_s17 = smov 0  }
   0x3   :  { %s2309_s18 = smov 0  }
   0x4 LB: > { %s23_s19 = sadd.s32 1, %s2265_s16  ;;  %s26_s20 = sadd.s32 1, %s2269_s17  ;;  %s2273_s18 = sphi %s2309_s18, %s14_s18   ;;  %s2269_s17 = sphi %s2307_s17, %s4573_s17   ;;  %s2265_s16 = sphi %s2305_s16, %s4572_s16   ;;  %s2261_s15 = sphi %s2303_s15, %s4571_s15   ;;  %s2257_s14 = sphi %s2301_s14, %s4570_s14   ;;  %s2253_s13 = sphi %s2299_s13, %s4569_s13   ;;  %s2249_s12 = sphi %s2297_s12, %s4568_s12  }
   0x5   : > { %p24_p0 = scmp.ge.s32.totalorder %s23_s19, 2  ;;  %s59_s21 = sadd.s32 1, %s2253_s13 }
   0x6   : > { %p66_p1 = scmp.ne.s32.totalorder %s2253_s13, %s2249_s12  ;;  %p67_p2 = scmp.eq.s32.totalorder %s2273_s18, 0 }
   0x7   : > { %s4575_s19 = smov (%p24_p0, %s23_s19), 0  ;;  %s4577_s20 = smov (!%p24_p0, %s26_s20), %s2269_s17 }
   0x8   : > { %s56_s22 = ssub.s32 %s2265_s16, %s4575_s19  ;;  %p68_p3 = por %p67_p2, %p66_p1 }
   0x9   : > { %p28_p4 = scmp.ge.s32.totalorder %s4577_s20, 2  ;;  %p57_p5 = scmp.eq.s32.totalorder %s56_s22, 0 }
   0xa   : > { %p2070_p6 = scmp.ge.s32.totalorder %s2273_s18, 4 }
   0xb   : > { %s4579_s20 = smov (%p28_p4, %s4577_s20), 0 }
   0xc   : > { %s2346_s23 = scalar_select %p57_p5, %s2253_s13, %s59_s21  }
   0xd   : > { %144 = sbr.rel (%p2070_p6) target bundleno = 28 (0x1c), region = 16 }
  0x14   : > { %156 = sbr.rel (!%p68_p3) target bundleno = 28 (0x1c), region = 24  ;;  %s158_s24 = sand.u32 (%p68_p3), 1, %s2253_s13  }
  0x15   : > { %s2072_s25 = sshll.u32 (%p68_p3), %s2265_s16, 3  ;;  %s2071_s26 = sshll.u32 (%p68_p3), %s158_s24, 6 }
  0x16   : > { %s162_s29 = scalar_lea.vmem (%p68_p3), %s4395_s1, %s2072_s25  ;;  %s160_s30 = scalar_lea.vmem (%p68_p3), [#allocation2], %s2071_s26 }
  0x17   : > { %v204_v0 = vld [vmem:[%s162_s29] sm:$0xff] (%p68_p3)  ;;  %v206_v1 = vld [vmem:[%s162_s29 + $0x10] sm:$0xff] (%p68_p3) }
  0x18   : > { %v208_v2 = vld [vmem:[%s162_s29 + $0x20] sm:$0xff] (%p68_p3)  ;;  %205 = vst [vmem:[%s160_s30] sm:$0xff] (%p68_p3), %v204_v0  ;;  %207 = vst [vmem:[%s160_s30 + $0x8] sm:$0xff] (%p68_p3), %v206_v1  ;;  %v210_v3 = vld [vmem:[%s162_s29 + $0x30] sm:$0xff] (%p68_p3) }
  0x19   : > { %209 = vst [vmem:[%s160_s30 + $0x10] sm:$0xff] (%p68_p3), %v208_v2  ;;  %v212_v4 = vld [vmem:[%s162_s29 + $0x40] sm:$0xff] (%p68_p3)  ;;  %v214_v5 = vld [vmem:[%s162_s29 + $0x50] sm:$0xff] (%p68_p3)  ;;  %211 = vst [vmem:[%s160_s30 + $0x18] sm:$0xff] (%p68_p3), %v210_v3 }
  0x1a   : > { %213 = vst [vmem:[%s160_s30 + $0x20] sm:$0xff] (%p68_p3), %v212_v4  ;;  %215 = vst [vmem:[%s160_s30 + $0x28] sm:$0xff] (%p68_p3), %v214_v5  ;;  %v216_v6 = vld [vmem:[%s162_s29 + $0x60] sm:$0xff] (%p68_p3)  ;;  %v218_v7 = vld [vmem:[%s162_s29 + $0x70] sm:$0xff] (%p68_p3) }
  0x1b   : > { %217 = vst [vmem:[%s160_s30 + $0x30] sm:$0xff] %v216_v6  ;;  %219 = vst [vmem:[%s160_s30 + $0x38] sm:$0xff] %v218_v7 }
  0x1c PF: > { %p2073_p7 = scmp.ge.s32.totalorder %s2273_s18, 1  ;;  %p224_p8 = scmp.lt.s32.totalorder %s2273_s18, 5 }
  0x1e   : > { %p225_p9 = pnand %p2073_p7, %p224_p8 }
  0x20   : > { %228 = sbr.rel (%p225_p9) target bundleno = 2117 (0x845), region = 62 }
  0x27   : > { %s231_s4 = sand.u32 1, %s2249_s12   ;;  %s2075_s5 = sshll.u32 %s2261_s15, 3 }
  0x28   : > { %s2074_s6 = sshll.u32 %s231_s4, 6  ;;  %p265_p10 = scmp.lt.s32.totalorder %s2075_s5, 15 }
  0x29   : > { %s2081_s7 = sshll.u32 %s2257_s14, 7  ;;  %s2374_s15 = scalar_lea.vmem [#allocation2], %s2074_s6 }
  0x2a   : > { %s4581_s5 = smov (!%p265_p10, %s2075_s5), 15  ;;  %p2082_p11 = scmp.ne.s32.totalorder %s2257_s14, 0 }
  0x2b   : > { %s2076_s8 = sshll.u32 %s4581_s5, 3  ;;  %vm287_vm0 = vcmask (!%p2082_p11), 31744   ;;  %v2275_v8 = vmov (!%p2082_p11), -inf   ;;  %v2276_v9 = vmov (!%p2082_p11), 0  }
  0x2c   : > { %s2362_s11 = scalar_lea.vmem %s4394_s0, %s2076_s8  ;;  %s2367_s24 = scalar_lea.vmem %s4396_s2, %s2076_s8 }
  0x2d   : > { %s2372_s12 = scalar_lea.vmem %s4397_s3, %s2076_s8  ;;  %286 = sbr.rel (%p2082_p11) target bundleno = 53 (0x35), region = 70  ;;  %288 = vst.msk [vmem:[%s2367_s24] sm:$0xff] (!%p2082_p11), %vm287_vm0, %v2275_v8  ;;  %289 = vst.msk [vmem:[%s2367_s24 + $0x8] sm:$0xff] (!%p2082_p11), %vm287_vm0, %v2275_v8 }
  0x2e   : > { %290 = vst.msk [vmem:[%s2367_s24 + $0x10] sm:$0xff] (!%p2082_p11), %vm287_vm0, %v2275_v8  ;;  %291 = vst.msk [vmem:[%s2367_s24 + $0x18] sm:$0xff] (!%p2082_p11), %vm287_vm0, %v2275_v8 }
  0x2f   : > { %292 = vst.msk [vmem:[%s2367_s24 + $0x20] sm:$0xff] (!%p2082_p11), %vm287_vm0, %v2275_v8  ;;  %293 = vst.msk [vmem:[%s2367_s24 + $0x28] sm:$0xff] (!%p2082_p11), %vm287_vm0, %v2275_v8 }
  0x30   : > { %294 = vst.msk [vmem:[%s2367_s24 + $0x30] sm:$0xff] (!%p2082_p11), %vm287_vm0, %v2275_v8  ;;  %295 = vst.msk [vmem:[%s2367_s24 + $0x38] sm:$0xff] (!%p2082_p11), %vm287_vm0, %v2275_v8 }
  0x31   : > { %296 = vst.msk [vmem:[%s2372_s12] sm:$0xff] (!%p2082_p11), %vm287_vm0, %v2276_v9  ;;  %297 = vst.msk [vmem:[%s2372_s12 + $0x8] sm:$0xff] (!%p2082_p11), %vm287_vm0, %v2276_v9 }
  0x32   : > { %298 = vst.msk [vmem:[%s2372_s12 + $0x10] sm:$0xff] (!%p2082_p11), %vm287_vm0, %v2276_v9  ;;  %299 = vst.msk [vmem:[%s2372_s12 + $0x18] sm:$0xff] (!%p2082_p11), %vm287_vm0, %v2276_v9 }
  0x33   : > { %300 = vst.msk [vmem:[%s2372_s12 + $0x20] sm:$0xff] (!%p2082_p11), %vm287_vm0, %v2276_v9  ;;  %301 = vst.msk [vmem:[%s2372_s12 + $0x28] sm:$0xff] (!%p2082_p11), %vm287_vm0, %v2276_v9 }
  0x34   : > { %302 = vst.msk [vmem:[%s2372_s12 + $0x30] sm:$0xff] %vm287_vm0, %v2276_v9  ;;  %303 = vst.msk [vmem:[%s2372_s12 + $0x38] sm:$0xff] %vm287_vm0, %v2276_v9 }
  0x35 PF: > { %v306_v10 = vld [vmem:[%s2374_s15] sm:$0xff]  ;;  %v307_v11 = vld [vmem:[%s2374_s15 + $0x8] sm:$0xff]  ;;  %v308_v12 = vld [vmem:[%s2374_s15 + $0x10] sm:$0xff]  ;;  %vm322_vm1 = vcmask 523264   ;;  %vm486_vm2 = vcmask 31744   ;;  %vm799_vm9 = vcmask 7168  }
  0x36   : > { %v2137_v13 = vpack.c.bf16 %v307_v11, %v306_v10  ;;  %v309_v14 = vld [vmem:[%s2374_s15 + $0x18] sm:$0xff]  ;;  %v310_v16 = vld [vmem:[%s2374_s15 + $0x20] sm:$0xff]  ;;  %v311_v17 = vld [vmem:[%s2374_s15 + $0x28] sm:$0xff] }
  0x37   : > { %v2141_v15 = vpack.c.bf16 %v309_v14, %v308_v12  ;;  %v314_v18 = vld [vmem:[%s2362_s11] sm:$0xff]  ;;  %v2145_v20 = vpack.c.bf16 %v311_v17, %v310_v16  ;;  %v312_v21 = vld [vmem:[%s2374_s15 + $0x30] sm:$0xff]  ;;  %v313_v24 = vld [vmem:[%s2374_s15 + $0x38] sm:$0xff] }
  0x38   : > { %2138 = vmatprep.subr.bf16.mxu0 %v2137_v13  ;;  %2153 = vmatprep.subr.bf16.mxu1 %v2137_v13  ;;  %v318_v19 = vld [vmem:[%s2362_s11 + $0x20] sm:$0xff]  ;;  %v2422_v23 = vld [vmem:[%s2367_s24 + $0x10] sm:$0xff]  ;;  %v2432_v27 = vld [vmem:[%s2367_s24 + $0x8] sm:$0xff]  ;;  %v2149_v31 = vpack.c.bf16 %v313_v24, %v312_v21 }
  0x39   : > { %2140 = vmatpush3.bf16.msra.mxu0 %v2137_v13  ;;  %2157 = vmatpush3.bf16.msra.mxu1 %v2137_v13  ;;  %v2419_v22 = vld [vmem:[%s2367_s24] sm:$0xff]  ;;  %4460 = vst [vmem:[#allocation3_spill] sm:$0xff] %v2422_v23  ;;  %v493_v26 = vsel %vm486_vm2, %v2422_v23, -inf  ;;  %v2435_v28 = vld [vmem:[%s2367_s24 + $0x18] sm:$0xff]  ;;  %v490_v29 = vsel %vm486_vm2, %v2432_v27, -inf  ;;  %v2442_v32 = vld [vmem:[%s2367_s24 + $0x28] sm:$0xff] }
  0x3a   : > { %2142 = vmatprep.subr.bf16.mxu0 %v2141_v15  ;;  %2154 = vmatprep.subr.bf16.mxu1 %v2141_v15  ;;  %v487_v25 = vsel %vm486_vm2, %v2419_v22, -inf  ;;  %4461 = vst [vmem:[#allocation4_spill] sm:$0xff] %v2435_v28  ;;  %v496_v30 = vsel %vm486_vm2, %v2435_v28, -inf  ;;  %4462 = vst [vmem:[#allocation5_spill] sm:$0xff] %v2442_v32  ;;  %v2445_v33 = vld [vmem:[%s2367_s24 + $0x20] sm:$0xff]  ;;  %v502_v34 = vsel %vm486_vm2, %v2442_v32, -inf }
  0x3b   : > { %2125 = vmatprep.mubr.msk.f32.mxu0 %vm322_vm1, %v314_v18  ;;  %2131 = vmatprep.mubr.msk.f32.mxu1 %vm322_vm1, %v318_v19  ;;  %4463 = vst [vmem:[#allocation6_spill] sm:$0xff] %v2445_v33  ;;  %v499_v35 = vsel %vm486_vm2, %v2445_v33, -inf  ;;  %v2452_v36 = vld [vmem:[%s2367_s24 + $0x38] sm:$0xff]  ;;  %v2455_v37 = vld [vmem:[%s2367_s24 + $0x30] sm:$0xff]  ;;  %v315_v38 = vld [vmem:[%s2362_s11 + $0x8] sm:$0xff] }
  0x3c   : > { %488 = vmax.xlane.f32.xlu0 %v487_v25  ;;  %494 = vmax.xlane.f32.xlu1 %v493_v26  ;;  %4464 = vst [vmem:[#allocation7_spill] sm:$0xff] %v2452_v36  ;;  %4465 = vst [vmem:[#allocation8_spill] sm:$0xff] %v2455_v37  ;;  %v319_v39 = vld [vmem:[%s2362_s11 + $0x28] sm:$0xff]  ;;  %v316_v40 = vld [vmem:[%s2362_s11 + $0x10] sm:$0xff]  ;;  %v508_v42 = vsel %vm486_vm2, %v2452_v36, -inf  ;;  %v505_v43 = vsel %vm486_vm2, %v2455_v37, -inf }
  0x3d   : > { %2144 = vmatpush3.bf16.msra.mxu0 %v2141_v15  ;;  %2158 = vmatpush3.bf16.msra.mxu1 %v2141_v15  ;;  %v320_v41 = vld [vmem:[%s2362_s11 + $0x30] sm:$0xff]  ;;  %v317_v44 = vld [vmem:[%s2362_s11 + $0x18] sm:$0xff]  ;;  %v2486_v52 = vld [vmem:[%s2372_s12 + $0x8] sm:$0xff] }
  0x3e   : > { %2146 = vmatprep.subr.bf16.mxu0 %v2145_v20  ;;  %2155 = vmatprep.subr.bf16.mxu1 %v2145_v20  ;;  %v321_v45 = vld [vmem:[%s2362_s11 + $0x38] sm:$0xff]  ;;  %v2496_v55 = vld [vmem:[%s2372_s12] sm:$0xff]  ;;  %v2520_v0 = vld [vmem:[%s2372_s12 + $0x10] sm:$0xff] }
  0x3f   : > { %v2510_v61 = vld [vmem:[%s2372_s12 + $0x18] sm:$0xff]  ;;  %4472 = vst [vmem:[#allocation15_spill] sm:$0xff] %v2520_v0  ;;  %v2536_v6 = vld [vmem:[%s2372_s12 + $0x28] sm:$0xff]  ;;  %v2543_v8 = vld [vmem:[%s2372_s12 + $0x20] sm:$0xff] }
  0x40   : > { %491 = vmax.xlane.f32.xlu0 %v490_v29  ;;  %497 = vmax.xlane.f32.xlu1 %v496_v30  ;;  %4469 = vst [vmem:[#allocation12_spill] sm:$0xff] %v2510_v61  ;;  %v304_v30 = vlaneseq }
  0x41   : > { %2148 = vmatpush3.bf16.msra.mxu0 %v2145_v20  ;;  %2159 = vmatpush3.bf16.msra.mxu1 %v2145_v20 }
  0x42   : > { %2150 = vmatprep.subr.bf16.mxu0 %v2149_v31  ;;  %2156 = vmatprep.subr.bf16.mxu1 %v2149_v31 }
  0x44   : > { %503 = vmax.xlane.f32.xlu1 %v502_v34  ;;  %500 = vmax.xlane.f32.xlu0 %v499_v35  ;;  %v305_v34 = vand.u32 127, %v304_v30 }
  0x45   : > { %2152 = vmatpush3.bf16.msra.mxu0 %v2149_v31  ;;  %2160 = vmatpush3.bf16.msra.mxu1 %v2149_v31 }
  0x48   : > { %2126 = vmatmul.mubr.msk.f32.vlgmr.msra.gmra.mrb[0].mxu0 %vm322_vm1, %v315_v38  ;;  %2132 = vmatmul.mubr.msk.f32.vlgmr.msra.gmra.mrb[0].mxu1 %vm322_vm1, %v319_v39  ;;  %v452_v38 = vstv %s2081_s7 }
  0x49   : > { %2128 = vmatprep.mubr.msk.f32.mxu0 %vm322_vm1, %v316_v40  ;;  %2134 = vmatprep.mubr.msk.f32.mxu1 %vm322_vm1, %v320_v41  ;;  %v2593_v39 = vadd.s32 %v452_v38, %v305_v34 }
  0x4a   : > { %509 = vmax.xlane.f32.xlu1 %v508_v42  ;;  %506 = vmax.xlane.f32.xlu0 %v505_v43 }
  0x4c   : > { %2129 = vmatmul.mubr.msk.f32.gmra.mrb[2].mxu0 %vm322_vm1, %v317_v44  ;;  %2135 = vmatmul.mubr.msk.f32.gmra.mrb[2].mxu1 %vm322_vm1, %v321_v45 }
  0xc9   : > { %v2473_v46 = vpop.xlane.xlu0 %488  ;;  %v2475_v47 = vpop.xlane.xlu1 %494 }
  0xca   : > { %4466 = vst [vmem:[#allocation9_spill] sm:$0xff] %v2475_v47  ;;  %vm639_vm4 = vcmp.eq.f32.partialorder %v2419_v22, %v2473_v46  ;;  %vm641_vm6 = vcmp.eq.f32.partialorder %v2422_v23, %v2475_v47 }
  0xcb   : > { %v647_v60 = vsel %vm639_vm4, %v2496_v55, 2147483647  ;;  %v649_v5 = vsel %vm641_vm6, %v2520_v0, 2147483647 }
  0xcc   : > { %v2531_v3 = vsel %vm486_vm2, %v647_v60, 2147483647  ;;  %v2553_v11 = vsel %vm486_vm2, %v649_v5, 2147483647 }
  0xcd   : > { %v2477_v48 = vpop.xlane.xlu0 %491  ;;  %v2479_v49 = vpop.xlane.xlu1 %497  ;;  %v657_v9 = vshra.s32 %v2531_v3, 16  ;;  %v687_v17 = vshra.s32 %v2553_v11, 16 }
  0xce   : > { %vm640_vm3 = vcmp.eq.f32.partialorder %v2432_v27, %v2477_v48  ;;  %vm642_vm5 = vcmp.eq.f32.partialorder %v2435_v28, %v2479_v49 }
  0xcf   : > { %v648_v57 = vsel %vm640_vm3, %v2486_v52, 2147483647  ;;  %v650_v4 = vsel %vm642_vm5, %v2510_v61, 2147483647  ;;  %v2562_v16 = vcvt.s32.f32 %v657_v9  ;;  %v2576_v24 = vcvt.s32.f32 %v687_v17  ;;  %v2640_v9 = vld [vmem:[%s2372_s12 + $0x38] sm:$0xff] }
  0xd0   : > { %v2526_v1 = vsel %vm486_vm2, %v648_v57, 2147483647  ;;  %v2550_v10 = vsel %vm486_vm2, %v650_v4, 2147483647  ;;  %4475 = vst [vmem:[#allocation18_spill] sm:$0xff] %v2640_v9  ;;  %v656_v61 = vand.u32 65535, %v2531_v3 }
  0xd1   : > { %v2501_v56 = vpop.xlane.xlu1 %503  ;;  %v2528_v2 = vpop.xlane.xlu0 %500  ;;  %v672_v7 = vshra.s32 %v2526_v1, 16  ;;  %v702_v15 = vshra.s32 %v2550_v10, 16  ;;  %v686_v3 = vand.u32 65535, %v2553_v11 }
  0xd2   : > { %vm644_vm7 = vcmp.eq.f32.partialorder %v2442_v32, %v2501_v56  ;;  %vm643_vm8 = vcmp.eq.f32.partialorder %v2445_v33, %v2528_v2 }
  0xd3   : > { %v652_v12 = vsel %vm644_vm7, %v2536_v6, 2147483647  ;;  %v651_v13 = vsel %vm643_vm8, %v2543_v8, 2147483647  ;;  %v2558_v14 = vcvt.s32.f32 %v672_v7  ;;  %v2572_v20 = vcvt.s32.f32 %v702_v15 }
  0xd4   : > { %v2566_v18 = vsel %vm486_vm2, %v652_v12, 2147483647  ;;  %v2569_v19 = vsel %vm486_vm2, %v651_v13, 2147483647 }
  0xd5   : > { %v732_v21 = vshra.s32 %v2566_v18, 16  ;;  %v717_v25 = vshra.s32 %v2569_v19, 16  ;;  %v716_v11 = vand.u32 65535, %v2569_v19 }
  0xd7   : > { %v2580_v26 = vcvt.s32.f32 %v732_v21  ;;  %v2583_v29 = vcvt.s32.f32 %v717_v25  ;;  %v2587_v31 = vpop.xlane.xlu1 %509  ;;  %v2589_v35 = vpop.xlane.xlu0 %506 }
  0xd8   : > { %4473 = vst [vmem:[#allocation16_spill] sm:$0xff] %v2587_v31  ;;  %4474 = vst [vmem:[#allocation17_spill] sm:$0xff] %v2589_v35  ;;  %vm646_vm0 = vcmp.eq.f32.partialorder %v2452_v36, %v2587_v31  ;;  %vm645_vm4 = vcmp.eq.f32.partialorder %v2455_v37, %v2589_v35 }
  0xd9   : > { %v654_v34 = vsel %vm646_vm0, %v2640_v9, 2147483647 }
 0x11b   : > { %v2481_v50 = vpop.f32.mrb[0].mxu0  ;;  %v2483_v51 = vpop.f32.mrb[0].mxu1 }
 0x11c   : > { %472 = vmax.xlane.f32.xlu1 %v2481_v50  ;;  %v2491_v53 = vpop.f32.mrb[1].mxu0  ;;  %v2493_v54 = vpop.f32.mrb[1].mxu1 }
 0x11d   : > { %470 = vmax.xlane.f32.xlu0 %v2491_v53 }
 0x11f   : > { %v2504_v58 = vpop.f32.mrb[2].mxu0  ;;  %v2506_v59 = vpop.f32.mrb[2].mxu1 }
 0x120   : > { %4467 = vst [vmem:[#allocation10_spill] sm:$0xff] %v2504_v58  ;;  %4468 = vst [vmem:[#allocation11_spill] sm:$0xff] %v2506_v59  ;;  %480 = vmax.xlane.f32.xlu1 %v2483_v51  ;;  %v2515_v62 = vpop.f32.mrb[3].mxu0  ;;  %v2517_v63 = vpop.f32.mrb[3].mxu1 }
 0x121   : > { %4470 = vst [vmem:[#allocation13_spill] sm:$0xff] %v2515_v62  ;;  %4471 = vst [vmem:[#allocation14_spill] sm:$0xff] %v2517_v63  ;;  %478 = vmax.xlane.f32.xlu0 %v2493_v54 }
 0x124   : > { %476 = vmax.xlane.f32.xlu1 %v2504_v58 }
 0x125   : > { %474 = vmax.xlane.f32.xlu0 %v2515_v62 }
 0x128   : > { %484 = vmax.xlane.f32.xlu1 %v2506_v59 }
 0x129   : > { %482 = vmax.xlane.f32.xlu0 %v2517_v63 }
 0x12c   : > { %675 = vmin.xlane.f32.xlu1 %v2558_v14 }
 0x12d   : > { %660 = vmin.xlane.f32.xlu0 %v2562_v16 }
 0x130   : > { %705 = vmin.xlane.f32.xlu1 %v2572_v20 }
 0x131   : > { %690 = vmin.xlane.f32.xlu0 %v2576_v24 }
 0x134   : > { %735 = vmin.xlane.f32.xlu1 %v2580_v26 }
 0x135   : > { %720 = vmin.xlane.f32.xlu0 %v2583_v29 }
 0x1a9   : > { %v2595_v40 = vpop.xlane.xlu1 %472 }
 0x1aa   : > { %vm776_vm10 = vcmp.ge.f32.partialorder %v2477_v48, %v2595_v40  ;;  %v2599_v41 = vpop.xlane.xlu0 %470  ;;  %vm512_vm11 = vcmp.eq.f32.partialorder %v2481_v50, %v2595_v40 }
 0x1ab   : > { %v784_v42 = vsel %vm776_vm10, %v2477_v48, %v2595_v40  ;;  %vm775_vm12 = vcmp.ge.f32.partialorder %v2473_v46, %v2599_v41  ;;  %v2611_v43 = vsel %vm512_vm11, %v2593_v39, 2147483647  ;;  %vm511_vm13 = vcmp.eq.f32.partialorder %v2491_v53, %v2599_v41 }
 0x1ac   : > { %801 = vst.msk [vmem:[%s2367_s24 + $0x8] sm:$0xff] %vm799_vm9, %v784_v42  ;;  %v783_v44 = vsel %vm775_vm12, %v2473_v46, %v2599_v41  ;;  %v542_v45 = vshra.s32 %v2611_v43, 16  ;;  %v2624_v57 = vsel %vm511_vm13, %v2593_v39, 2147483647 }
 0x1ad   : > { %800 = vst.msk [vmem:[%s2367_s24] sm:$0xff] %vm799_vm9, %v783_v44  ;;  %v2628_v60 = vpop.xlane.xlu1 %480  ;;  %v528_v4 = vshra.s32 %v2624_v57, 16 }
 0x1ae   : > { %vm780_vm14 = vcmp.ge.f32.partialorder %v2501_v56, %v2628_v60  ;;  %v2633_v5 = vpop.xlane.xlu0 %478  ;;  %v2635_v7 = vcvt.s32.f32 %v542_v45  ;;  %vm516_vm15 = vcmp.eq.f32.partialorder %v2483_v51, %v2628_v60  ;;  %v2688_v45 = vld [vmem:[%s2372_s12 + $0x30] sm:$0xff] }
 0x1af   : > { %v788_v12 = vsel %vm780_vm14, %v2501_v56, %v2628_v60  ;;  %vm779_vm1 = vcmp.ge.f32.partialorder %v2528_v2, %v2633_v5  ;;  %v2651_v13 = vcvt.s32.f32 %v528_v4  ;;  %v2654_v15 = vsel %vm516_vm15, %v2593_v39, 2147483647  ;;  %4477 = vst [vmem:[#allocation20_spill] sm:$0xff] %v2688_v45 }
 0x1b0   : > { %805 = vst.msk [vmem:[%s2367_s24 + $0x28] sm:$0xff] %vm799_vm9, %v788_v12  ;;  %v787_v17 = vsel %vm779_vm1, %v2528_v2, %v2633_v5  ;;  %545 = vmin.xlane.f32.xlu1 %v2635_v7  ;;  %v598_v21 = vshra.s32 %v2654_v15, 16  ;;  %vm515_vm3 = vcmp.eq.f32.partialorder %v2493_v54, %v2633_v5 }
 0x1b1   : > { %804 = vst.msk [vmem:[%s2367_s24 + $0x20] sm:$0xff] %vm799_vm9, %v787_v17  ;;  %v2669_v25 = vpop.xlane.xlu1 %476  ;;  %531 = vmin.xlane.f32.xlu0 %v2651_v13  ;;  %v2673_v30 = vsel %vm515_vm3, %v2593_v39, 2147483647 }
 0x1b2   : > { %vm778_vm5 = vcmp.ge.f32.partialorder %v2479_v49, %v2669_v25  ;;  %v2680_v38 = vpop.xlane.xlu0 %474  ;;  %v2682_v42 = vcvt.s32.f32 %v598_v21  ;;  %v584_v44 = vshra.s32 %v2673_v30, 16  ;;  %vm514_vm6 = vcmp.eq.f32.partialorder %v2504_v58, %v2669_v25 }
 0x1b3   : > { %4476 = vst [vmem:[#allocation19_spill] sm:$0xff] %v2680_v38  ;;  %v786_v4 = vsel %vm778_vm5, %v2479_v49, %v2669_v25  ;;  %vm777_vm7 = vcmp.ge.f32.partialorder %v2475_v47, %v2680_v38  ;;  %v2698_v12 = vsel %vm514_vm6, %v2593_v39, 2147483647  ;;  %vm513_vm8 = vcmp.eq.f32.partialorder %v2515_v62, %v2680_v38 }
 0x1b4   : > { %803 = vst.msk [vmem:[%s2367_s24 + $0x18] sm:$0xff] %vm799_vm9, %v786_v4  ;;  %v785_v17 = vsel %vm777_vm7, %v2475_v47, %v2680_v38  ;;  %601 = vmin.xlane.f32.xlu1 %v2682_v42  ;;  %v2710_v21 = vcvt.s32.f32 %v584_v44  ;;  %v570_v36 = vshra.s32 %v2698_v12, 16  ;;  %v2714_v23 = vsel %vm513_vm8, %v2593_v39, 2147483647 }
 0x1b5   : > { %802 = vst.msk [vmem:[%s2367_s24 + $0x10] sm:$0xff] %vm799_vm9, %v785_v17  ;;  %v2718_v9 = vpop.xlane.xlu1 %484  ;;  %v556_v4 = vshra.s32 %v2714_v23, 16  ;;  %v653_v62 = vsel %vm645_vm4, %v2688_v45, 2147483647  ;;  %v2735_v17 = vsel %vm486_vm2, %v654_v34, 2147483647  ;;  %v658_v47 = vcvt.s32.f32 %v656_v61 }
 0x1b6   : > { %4478 = vst [vmem:[#allocation21_spill] sm:$0xff] %v2718_v9  ;;  %vm782_vm11 = vcmp.ge.f32.partialorder %v2587_v31, %v2718_v9  ;;  %587 = vmin.xlane.f32.xlu0 %v2710_v21  ;;  %v2728_v44 = vpop.xlane.xlu0 %482  ;;  %v2730_v28 = vcvt.s32.f32 %v570_v36  ;;  %vm518_vm13 = vcmp.eq.f32.partialorder %v2506_v59, %v2718_v9  ;;  %v688_v61 = vcvt.s32.f32 %v686_v3 }
 0x1b7   : > { %4479 = vst [vmem:[#allocation22_spill] sm:$0xff] %v2728_v44  ;;  %v790_v37 = vsel %vm782_vm11, %v2587_v31, %v2718_v9  ;;  %vm781_vm15 = vcmp.ge.f32.partialorder %v2589_v35, %v2728_v44  ;;  %v2744_v45 = vcvt.s32.f32 %v556_v4  ;;  %v2747_v36 = vsel %vm518_vm13, %v2593_v39, 2147483647 }
 0x1b8   : > { %807 = vst.msk [vmem:[%s2367_s24 + $0x38] sm:$0xff] %vm799_vm9, %v790_v37  ;;  %v789_v34 = vsel %vm781_vm15, %v2589_v35, %v2728_v44  ;;  %573 = vmin.xlane.f32.xlu1 %v2730_v28  ;;  %v626_v59 = vshra.s32 %v2747_v36, 16  ;;  %vm517_vm0 = vcmp.eq.f32.partialorder %v2517_v63, %v2728_v44  ;;  %v2768_v37 = vsel %vm486_vm2, %v653_v62, 2147483647 }
 0x1b9   : > { %806 = vst.msk [vmem:[%s2367_s24 + $0x30] sm:$0xff] %vm799_vm9, %v789_v34  ;;  %v2762_v4 = vpop.xlane.xlu1 %675  ;;  %v2765_v0 = vsel %vm517_vm0, %v2593_v39, 2147483647  ;;  %v762_v9 = vshra.s32 %v2735_v17, 16  ;;  %v747_v63 = vshra.s32 %v2768_v37, 16  ;;  %v671_v44 = vand.u32 65535, %v2526_v1 }
 0x1ba   : > { %559 = vmin.xlane.f32.xlu0 %v2744_v45  ;;  %v2771_v35 = vcvt.s32.f32 %v626_v59  ;;  %v612_v58 = vshra.s32 %v2765_v0, 16  ;;  %v2775_v31 = vpop.xlane.xlu0 %660  ;;  %vm677_vm3 = vcmp.eq.f32.partialorder %v2558_v14, %v2762_v4  ;;  %v701_v1 = vand.u32 65535, %v2550_v10 }
 0x1bb   : > { %v2783_v62 = vcvt.s32.f32 %v762_v9  ;;  %v2789_v33 = vcvt.s32.f32 %v747_v63  ;;  %v673_v38 = vcvt.s32.f32 %v671_v44  ;;  %vm662_vm4 = vcmp.eq.f32.partialorder %v2562_v16, %v2775_v31 }
 0x1bc   : > { %629 = vmin.xlane.f32.xlu1 %v2771_v35  ;;  %v2778_v34 = vcvt.s32.f32 %v612_v58  ;;  %v663_v14 = vsel %vm662_vm4, %v658_v47, inf  ;;  %v703_v32 = vcvt.s32.f32 %v701_v1  ;;  %v731_v44 = vand.u32 65535, %v2566_v18 }
 0x1bd   : > { %v2785_v59 = vpop.xlane.xlu1 %705  ;;  %v678_v9 = vsel %vm677_vm3, %v673_v38, inf  ;;  %v718_v18 = vcvt.s32.f32 %v716_v11  ;;  %v527_v1 = vand.u32 65535, %v2624_v57 }
 0x1be   : > { %615 = vmin.xlane.f32.xlu0 %v2778_v34  ;;  %v2793_v58 = vpop.xlane.xlu0 %690  ;;  %vm707_vm6 = vcmp.eq.f32.partialorder %v2572_v20, %v2785_v59  ;;  %v733_v38 = vcvt.s32.f32 %v731_v44  ;;  %v583_v44 = vand.u32 65535, %v2673_v30 }
 0x1bf   : > { %vm692_vm8 = vcmp.eq.f32.partialorder %v2576_v24, %v2793_v58  ;;  %v708_v16 = vsel %vm707_vm6, %v703_v32, inf  ;;  %v541_v32 = vand.u32 65535, %v2611_v43 }
 0x1c0   : > { %765 = vmin.xlane.f32.xlu1 %v2783_v62  ;;  %v693_v20 = vsel %vm692_vm8, %v688_v61, inf  ;;  %v585_v11 = vcvt.s32.f32 %v583_v44 }
 0x1c1   : > { %v2802_v63 = vpop.xlane.xlu1 %735 }
 0x1c2   : > { %750 = vmin.xlane.f32.xlu0 %v2789_v33  ;;  %v2807_v10 = vpop.xlane.xlu0 %720  ;;  %vm737_vm13 = vcmp.eq.f32.partialorder %v2580_v26, %v2802_v63  ;;  %v597_v26 = vand.u32 65535, %v2654_v15  ;;  %v569_v15 = vand.u32 65535, %v2698_v12 }
 0x1c3   : > { %vm722_vm0 = vcmp.eq.f32.partialorder %v2583_v29, %v2807_v10  ;;  %v738_v47 = vsel %vm737_vm13, %v733_v38, inf  ;;  %v529_v29 = vcvt.s32.f32 %v527_v1 }
 0x1c4   : > { %679 = vmin.xlane.f32.xlu1 %v678_v9  ;;  %v723_v24 = vsel %vm722_vm0, %v718_v18, inf  ;;  %v543_v9 = vcvt.s32.f32 %v541_v32  ;;  %v571_v38 = vcvt.s32.f32 %v569_v15  ;;  %v682_v15 = vcvt.f32.s32 %v2762_v4 }
 0x1c6   : > { %664 = vmin.xlane.f32.xlu0 %v663_v14 }
 0x1c8   : > { %709 = vmin.xlane.f32.xlu1 %v708_v16  ;;  %v599_v16 = vcvt.s32.f32 %v597_v26 }
 0x1ca   : > { %694 = vmin.xlane.f32.xlu0 %v693_v20  ;;  %v555_v20 = vand.u32 65535, %v2714_v23  ;;  %v611_v23 = vand.u32 65535, %v2765_v0  ;;  %v746_v0 = vand.u32 65535, %v2768_v37 }
 0x1cc   : > { %739 = vmin.xlane.f32.xlu1 %v738_v47  ;;  %v625_v47 = vand.u32 65535, %v2747_v36  ;;  %v557_v18 = vcvt.s32.f32 %v555_v20  ;;  %v761_v36 = vand.u32 65535, %v2735_v17 }
 0x1ce   : > { %724 = vmin.xlane.f32.xlu0 %v723_v24  ;;  %v627_v32 = vcvt.s32.f32 %v625_v47 }
 0x23d   : > { %v2816_v19 = vpop.xlane.xlu1 %545 }
 0x23e   : > { %v2819_v3 = vpop.xlane.xlu0 %531  ;;  %vm547_vm3 = vcmp.eq.f32.partialorder %v2635_v7, %v2816_v19 }
 0x23f   : > { %v548_v14 = vsel %vm547_vm3, %v543_v9, inf  ;;  %vm533_vm4 = vcmp.eq.f32.partialorder %v2651_v13, %v2819_v3  ;;  %v613_v9 = vcvt.s32.f32 %v611_v23  ;;  %v538_v47 = vcvt.f32.s32 %v2819_v3 }
 0x240   : > { %549 = vmin.xlane.f32.xlu1 %v548_v14  ;;  %v534_v43 = vsel %vm533_vm4, %v529_v29, inf  ;;  %v763_v29 = vcvt.s32.f32 %v761_v36  ;;  %v748_v14 = vcvt.s32.f32 %v746_v0  ;;  %v727_v23 = vcvt.f32.s32 %v2807_v10 }
 0x241   : > { %v2826_v57 = vpop.xlane.xlu1 %601  ;;  %535 = vmin.xlane.f32.xlu0 %v534_v43  ;;  %v539_v0 = vshll.u32 %v538_v47, 16 }
 0x242   : > { %vm603_vm6 = vcmp.eq.f32.partialorder %v2682_v42, %v2826_v57 }
 0x243   : > { %v2831_v61 = vpop.xlane.xlu0 %587  ;;  %v604_v7 = vsel %vm603_vm6, %v599_v16, inf }
 0x244   : > { %605 = vmin.xlane.f32.xlu1 %v604_v7  ;;  %vm589_vm8 = vcmp.eq.f32.partialorder %v2710_v21, %v2831_v61  ;;  %v712_v7 = vcvt.f32.s32 %v2785_v59 }
 0x245   : > { %v2836_v13 = vpop.xlane.xlu1 %573  ;;  %v590_v30 = vsel %vm589_vm8, %v585_v11, inf  ;;  %v697_v11 = vcvt.f32.s32 %v2793_v58 }
 0x246   : > { %591 = vmin.xlane.f32.xlu0 %v590_v30  ;;  %vm575_vm13 = vcmp.eq.f32.partialorder %v2730_v28, %v2836_v13  ;;  %v552_v30 = vcvt.f32.s32 %v2816_v19  ;;  %v713_v4 = vshll.u32 %v712_v7, 16  ;;  %v594_v19 = vcvt.f32.s32 %v2831_v61 }
 0x247   : > { %v2841_v42 = vpop.xlane.xlu0 %559  ;;  %v576_v12 = vsel %vm575_vm13, %v571_v38, inf  ;;  %v683_v38 = vshll.u32 %v682_v15, 16 }
 0x248   : > { %577 = vmin.xlane.f32.xlu1 %v576_v12  ;;  %vm561_vm0 = vcmp.eq.f32.partialorder %v2744_v45, %v2841_v42  ;;  %v553_v36 = vshll.u32 %v552_v30, 16 }
 0x249   : > { %v2846_v21 = vpop.xlane.xlu1 %629  ;;  %v562_v24 = vsel %vm561_vm0, %v557_v18, inf  ;;  %v742_v18 = vcvt.f32.s32 %v2802_v63  ;;  %v566_v63 = vcvt.f32.s32 %v2841_v42 }
 0x24a   : > { %563 = vmin.xlane.f32.xlu0 %v562_v24  ;;  %vm631_vm3 = vcmp.eq.f32.partialorder %v2771_v35, %v2846_v21  ;;  %v636_v48 = vcvt.f32.s32 %v2846_v21 }
 0x24b   : > { %v2851_v28 = vpop.xlane.xlu0 %615  ;;  %v632_v1 = vsel %vm631_vm3, %v627_v32, inf  ;;  %v2876_v32 = vshll.u32 %v697_v11, 16  ;;  %v567_v11 = vshll.u32 %v566_v63, 16 }
 0x24c   : > { %633 = vmin.xlane.f32.xlu1 %v632_v1  ;;  %vm617_vm4 = vcmp.eq.f32.partialorder %v2778_v34, %v2851_v28  ;;  %v580_v1 = vcvt.f32.s32 %v2836_v13  ;;  %v622_v21 = vcvt.f32.s32 %v2851_v28 }
 0x24d   : > { %v2856_v45 = vpop.xlane.xlu1 %765  ;;  %v618_v26 = vsel %vm617_vm4, %v613_v9, inf }
 0x24e   : > { %619 = vmin.xlane.f32.xlu0 %v618_v26  ;;  %vm767_vm6 = vcmp.eq.f32.partialorder %v2783_v62, %v2856_v45  ;;  %v667_v62 = vcvt.f32.s32 %v2775_v31  ;;  %v608_v31 = vcvt.f32.s32 %v2826_v57  ;;  %v581_v13 = vshll.u32 %v580_v1, 16 }
 0x24f   : > { %v2860_v17 = vpop.xlane.xlu0 %750  ;;  %v768_v35 = vsel %vm767_vm6, %v763_v29, inf  ;;  %v743_v29 = vshll.u32 %v742_v18, 16  ;;  %v772_v60 = vcvt.f32.s32 %v2856_v45 }
 0x250   : > { %769 = vmin.xlane.f32.xlu1 %v768_v35  ;;  %vm752_vm8 = vcmp.eq.f32.partialorder %v2789_v33, %v2860_v17  ;;  %v668_v12 = vshll.u32 %v667_v62, 16  ;;  %v728_v35 = vshll.u32 %v727_v23, 16  ;;  %v609_v57 = vshll.u32 %v608_v31, 16 }
 0x251   : > { %v753_v37 = vsel %vm752_vm8, %v748_v14, inf  ;;  %v680_v44 = vpop.xlane.xlu1 %679  ;;  %v595_v62 = vshll.u32 %v594_v19, 16  ;;  %v773_v1 = vshll.u32 %v772_v60, 16 }
 0x252   : > { %754 = vmin.xlane.f32.xlu0 %v753_v37  ;;  %v681_v24 = vcvt.f32.s32 %v680_v44 }
 0x253   : > { %v665_v34 = vpop.xlane.xlu0 %664 }
 0x254   : > { %v666_v59 = vcvt.f32.s32 %v665_v34  ;;  %v684_v14 = vadd.s32 %v683_v38, %v681_v24 }
 0x255   : > { %v2864_v43 = vpop.xlane.xlu1 %709 }
 0x256   : > { %v669_v44 = vadd.s32 %v668_v12, %v666_v59  ;;  %v711_v40 = vcvt.f32.s32 %v2864_v43 }
 0x257   : > { %v2866_v16 = vpop.xlane.xlu0 %694 }
 0x258   : > { %v696_v43 = vcvt.f32.s32 %v2866_v16  ;;  %v714_v28 = vadd.s32 %v713_v4, %v711_v40 }
 0x259   : > { %v740_v20 = vpop.xlane.xlu1 %739 }
 0x25a   : > { %v741_v26 = vcvt.f32.s32 %v740_v20  ;;  %v699_v45 = vadd.s32 %v2876_v32, %v696_v43  ;;  %v637_v32 = vshll.u32 %v636_v48, 16  ;;  %v4497_v43 = vld [vmem:[#allocation3_spill] sm:$0xff] }
 0x25b   : > { %v725_v33 = vpop.xlane.xlu0 %724 }
 0x25c   : > { %v726_v34 = vcvt.f32.s32 %v725_v33  ;;  %v744_v20 = vadd.s32 %v743_v29, %v741_v26  ;;  %v4483_v29 = vld [vmem:[#allocation6_spill] sm:$0xff] }
 0x25e   : > { %v729_v18 = vadd.s32 %v728_v35, %v726_v34 }
 0x2cd   : > { %v550_v58 = vpop.xlane.xlu1 %549 }
 0x2ce   : > { %v551_v9 = vcvt.f32.s32 %v550_v58  ;;  %v536_v3 = vpop.xlane.xlu0 %535 }
 0x2cf   : > { %v537_v10 = vcvt.f32.s32 %v536_v3  ;;  %v4480_v3 = vld [vmem:[#allocation5_spill] sm:$0xff] }
 0x2d0   : > { %v554_v37 = vadd.s32 %v553_v36, %v551_v9  ;;  %v757_v36 = vcvt.f32.s32 %v2860_v17 }
 0x2d1   : > { %v540_v15 = vadd.s32 %v539_v0, %v537_v10  ;;  %v606_v61 = vpop.xlane.xlu1 %605 }
 0x2d2   : > { %v607_v7 = vcvt.f32.s32 %v606_v61  ;;  %v792_v42 = vsel %vm776_vm10, %v684_v14, %v554_v37  ;;  %v623_v14 = vshll.u32 %v622_v21, 16  ;;  %v758_v37 = vshll.u32 %v757_v36, 16  ;;  %v4496_v21 = vld [vmem:[#allocation18_spill] sm:$0xff] }
 0x2d3   : > { %v592_v30 = vpop.xlane.xlu0 %591  ;;  %vm817_vm13 = vcmp.eq.s32.totalorder %v2593_v39, %v792_v42  ;;  %809 = vst.msk [vmem:[%s2372_s12 + $0x8] sm:$0xff] %vm799_vm9, %v792_v42  ;;  %v791_v33 = vsel %vm775_vm12, %v669_v44, %v540_v15  ;;  %vm833_vm10 = vcmp.eq.s32.totalorder %v2486_v52, %v792_v42  ;;  %v4484_v42 = vld [vmem:[#allocation12_spill] sm:$0xff] }
 0x2d4   : > { %v610_v38 = vadd.s32 %v609_v57, %v607_v7  ;;  %v593_v47 = vcvt.f32.s32 %v592_v30  ;;  %v2892_v12 = vsel %vm817_vm13, -inf, %v2481_v50  ;;  %vm816_vm0 = vcmp.eq.s32.totalorder %v2593_v39, %v791_v33  ;;  %808 = vst.msk [vmem:[%s2372_s12] sm:$0xff] %vm799_vm9, %v791_v33 }
 0x2d5   : > { %850 = vmax.xlane.f32.xlu1 %v2892_v12  ;;  %v578_v23 = vpop.xlane.xlu1 %577  ;;  %v2901_v46 = vsel %vm816_vm0, -inf, %v2491_v53  ;;  %vm832_vm3 = vcmp.eq.s32.totalorder %v2496_v55, %v791_v33  ;;  %v4487_v33 = vld [vmem:[#allocation10_spill] sm:$0xff] }
 0x2d6   : > { %v596_v41 = vadd.s32 %v595_v62, %v593_v47  ;;  %v579_v24 = vcvt.f32.s32 %v578_v23  ;;  %848 = vmax.xlane.f32.xlu0 %v2901_v46  ;;  %v796_v50 = vsel %vm780_vm14, %v744_v20, %v610_v38  ;;  %v2940_v19 = vsel %vm832_vm3, -inf, %v2419_v22  ;;  %v4489_v47 = vld [vmem:[#allocation15_spill] sm:$0xff]  ;;  %v4492_v23 = vld [vmem:[#allocation4_spill] sm:$0xff] }
 0x2d7   : > { %v564_v31 = vpop.xlane.xlu0 %563  ;;  %vm821_vm12 = vcmp.eq.s32.totalorder %v2593_v39, %v796_v50  ;;  %813 = vst.msk [vmem:[%s2372_s12 + $0x28] sm:$0xff] %vm799_vm9, %v796_v50  ;;  %v864_v25 = vsel %vm486_vm2, %v2940_v19, -inf }
 0x2d8   : > { %v582_v53 = vadd.s32 %v581_v13, %v579_v24  ;;  %v565_v59 = vcvt.f32.s32 %v564_v31  ;;  %v2915_v58 = vsel %vm821_vm12, -inf, %v2483_v51  ;;  %v795_v56 = vsel %vm779_vm1, %v729_v18, %v596_v41  ;;  %v4494_v24 = vld [vmem:[#allocation13_spill] sm:$0xff] }
 0x2d9   : > { %858 = vmax.xlane.f32.xlu1 %v2915_v58  ;;  %v634_v16 = vpop.xlane.xlu1 %633  ;;  %vm820_vm14 = vcmp.eq.s32.totalorder %v2593_v39, %v795_v56  ;;  %812 = vst.msk [vmem:[%s2372_s12 + $0x20] sm:$0xff] %vm799_vm9, %v795_v56  ;;  %v2928_v51 = vsel %vm833_vm10, -inf, %v2432_v27  ;;  %vm837_vm1 = vcmp.eq.s32.totalorder %v2536_v6, %v796_v50  ;;  %vm836_vm4 = vcmp.eq.s32.totalorder %v2543_v8, %v795_v56  ;;  %v4500_v56 = vld [vmem:[#allocation7_spill] sm:$0xff] }
 0x2da   : > { %v568_v2 = vadd.s32 %v567_v11, %v565_v59  ;;  %v2932_v5 = vsel %vm820_vm14, -inf, %v2493_v54  ;;  %v794_v27 = vsel %vm778_vm5, %v714_v28, %v582_v53  ;;  %v635_v54 = vcvt.f32.s32 %v634_v16  ;;  %v4499_v59 = vld [vmem:[#allocation20_spill] sm:$0xff] }
 0x2db   : > { %856 = vmax.xlane.f32.xlu0 %v2932_v5  ;;  %v620_v4 = vpop.xlane.xlu0 %619  ;;  %v867_v17 = vsel %vm486_vm2, %v2928_v51, -inf  ;;  %811 = vst.msk [vmem:[%s2372_s12 + $0x18] sm:$0xff] %vm799_vm9, %v794_v27  ;;  %v2951_v22 = vsel %vm837_vm1, -inf, %v4480_v3  ;;  %v2959_v35 = vsel %vm836_vm4, -inf, %v4483_v29  ;;  %vm819_vm5 = vcmp.eq.s32.totalorder %v2593_v39, %v794_v27  ;;  %v4502_v16 = vld [vmem:[#allocation8_spill] sm:$0xff] }
 0x2dc   : > { %v793_v26 = vsel %vm777_vm7, %v699_v45, %v568_v2  ;;  %v621_v10 = vcvt.f32.s32 %v620_v4  ;;  %v638_v44 = vadd.s32 %v637_v32, %v635_v54  ;;  %v879_v61 = vsel %vm486_vm2, %v2951_v22, -inf  ;;  %v4504_v4 = vld [vmem:[#allocation11_spill] sm:$0xff]  ;;  %v4506_v54 = vld [vmem:[#allocation14_spill] sm:$0xff] }
 0x2dd   : > { %868 = vmax.xlane.f32.xlu1 %v867_v17  ;;  %v770_v9 = vpop.xlane.xlu1 %769  ;;  %810 = vst.msk [vmem:[%s2372_s12 + $0x10] sm:$0xff] %vm799_vm9, %v793_v26  ;;  %v876_v62 = vsel %vm486_vm2, %v2959_v35, -inf  ;;  %vm835_vm7 = vcmp.eq.s32.totalorder %v4484_v42, %v794_v27  ;;  %vm818_vm6 = vcmp.eq.s32.totalorder %v2593_v39, %v793_v26  ;;  %v2976_v38 = vsel %vm819_vm5, -inf, %v4487_v33 }
 0x2de   : > { %v771_v49 = vcvt.f32.s32 %v770_v9  ;;  %v624_v13 = vadd.s32 %v623_v14, %v621_v10  ;;  %4488 = vst [vmem:[#allocation5_spill] sm:$0xff] %v2976_v38  ;;  %vm834_vm8 = vcmp.eq.s32.totalorder %v4489_v47, %v793_v26  ;;  %v2984_v41 = vsel %vm835_vm7, -inf, %v4492_v23 }
 0x2df   : > { %865 = vmax.xlane.f32.xlu0 %v864_v25  ;;  %v755_v57 = vpop.xlane.xlu0 %754  ;;  %4493 = vst [vmem:[#allocation9_spill] sm:$0xff] %v2984_v41  ;;  %v2989_v50 = vsel %vm818_vm6, -inf, %v4494_v24  ;;  %v2994_v31 = vsel %vm834_vm8, -inf, %v4497_v43  ;;  %v873_v53 = vsel %vm486_vm2, %v2984_v41, -inf  ;;  %vm1176_vm14 = vcmask 15368  }
 0x2e0   : > { %v774_v34 = vadd.s32 %v773_v1, %v771_v49  ;;  %v756_v15 = vcvt.f32.s32 %v755_v57  ;;  %4495 = vst [vmem:[#allocation19_spill] sm:$0xff] %v2989_v50  ;;  %4498 = vst [vmem:[#allocation6_spill] sm:$0xff] %v2994_v31  ;;  %v870_v28 = vsel %vm486_vm2, %v2994_v31, -inf }
 0x2e1   : > { %880 = vmax.xlane.f32.xlu1 %v879_v61 }
 0x2e2   : > { %v759_v7 = vadd.s32 %v758_v37, %v756_v15  ;;  %v798_v30 = vsel %vm782_vm11, %v774_v34, %v638_v44 }
 0x2e3   : > { %877 = vmax.xlane.f32.xlu0 %v876_v62  ;;  %815 = vst.msk [vmem:[%s2372_s12 + $0x38] sm:$0xff] %vm799_vm9, %v798_v30  ;;  %vm839_vm11 = vcmp.eq.s32.totalorder %v4496_v21, %v798_v30 }
 0x2e4   : > { %v797_v18 = vsel %vm781_vm15, %v759_v7, %v624_v13  ;;  %v3000_v60 = vsel %vm839_vm11, -inf, %v4500_v56 }
 0x2e5   : > { %854 = vmax.xlane.f32.xlu1 %v2976_v38  ;;  %814 = vst.msk [vmem:[%s2372_s12 + $0x30] sm:$0xff] %vm799_vm9, %v797_v18  ;;  %vm838_vm15 = vcmp.eq.s32.totalorder %v4499_v59, %v797_v18  ;;  %4501 = vst [vmem:[#allocation16_spill] sm:$0xff] %v3000_v60  ;;  %v885_v2 = vsel %vm486_vm2, %v3000_v60, -inf  ;;  %vm823_vm9 = vcmp.eq.s32.totalorder %v2593_v39, %v798_v30 }
 0x2e6   : > { %v3005_v36 = vsel %vm838_vm15, -inf, %v4502_v16  ;;  %vm822_vm13 = vcmp.eq.s32.totalorder %v2593_v39, %v797_v18  ;;  %v3014_v27 = vsel %vm823_vm9, -inf, %v4504_v4 }
 0x2e7   : > { %852 = vmax.xlane.f32.xlu0 %v2989_v50  ;;  %4503 = vst [vmem:[#allocation21_spill] sm:$0xff] %v3005_v36  ;;  %v882_v45 = vsel %vm486_vm2, %v3005_v36, -inf  ;;  %4505 = vst [vmem:[#allocation10_spill] sm:$0xff] %v3014_v27  ;;  %v3018_v17 = vsel %vm822_vm13, -inf, %v4506_v54 }
 0x2e8   : > { %4507 = vst [vmem:[#allocation17_spill] sm:$0xff] %v3018_v17 }
 0x2e9   : > { %874 = vmax.xlane.f32.xlu1 %v873_v53 }
 0x2eb   : > { %871 = vmax.xlane.f32.xlu0 %v870_v28 }
 0x2ed   : > { %886 = vmax.xlane.f32.xlu1 %v885_v2 }
 0x2ef   : > { %883 = vmax.xlane.f32.xlu0 %v882_v45 }
 0x2f1   : > { %862 = vmax.xlane.f32.xlu1 %v3014_v27 }
 0x2f3   : > { %860 = vmax.xlane.f32.xlu0 %v3018_v17 }
 0x362   : > { %v3021_v32 = vpop.xlane.xlu1 %850 }
 0x363   : > { %v3023_v1 = vpop.xlane.xlu0 %848  ;;  %vm889_vm0 = vcmp.eq.f32.partialorder %v2892_v12, %v3021_v32 }
 0x364   : > { %v3028_v9 = vsel %vm889_vm0, %v2593_v39, 2147483647  ;;  %vm888_vm10 = vcmp.eq.f32.partialorder %v2901_v46, %v3023_v1 }
 0x365   : > { %v919_v3 = vshra.s32 %v3028_v9, 16  ;;  %v3034_v0 = vsel %vm888_vm10, %v2593_v39, 2147483647 }
 0x366   : > { %v3036_v63 = vpop.xlane.xlu1 %858  ;;  %v905_v26 = vshra.s32 %v3034_v0, 16 }
 0x367   : > { %v3039_v10 = vcvt.s32.f32 %v919_v3  ;;  %vm893_vm12 = vcmp.eq.f32.partialorder %v2915_v58, %v3036_v63 }
 0x368   : > { %v3043_v49 = vpop.xlane.xlu0 %856  ;;  %v3045_v25 = vcvt.s32.f32 %v905_v26  ;;  %v3048_v29 = vsel %vm893_vm12, %v2593_v39, 2147483647 }
 0x369   : > { %922 = vmin.xlane.f32.xlu1 %v3039_v10  ;;  %v975_v14 = vshra.s32 %v3048_v29, 16  ;;  %vm892_vm3 = vcmp.eq.f32.partialorder %v2932_v5, %v3043_v49 }
 0x36a   : > { %v3054_v37 = vpop.xlane.xlu1 %868  ;;  %908 = vmin.xlane.f32.xlu0 %v3045_v25  ;;  %v3058_v57 = vsel %vm892_vm3, %v2593_v39, 2147483647 }
 0x36b   : > { %vm1153_vm1 = vcmp.ge.f32.partialorder %v3054_v37, %v3021_v32  ;;  %v3062_v44 = vcvt.s32.f32 %v975_v14  ;;  %v961_v34 = vshra.s32 %v3058_v57, 16  ;;  %vm1017_vm4 = vcmp.eq.f32.partialorder %v2928_v51, %v3054_v37 }
 0x36c   : > { %v1161_v15 = vsel %vm1153_vm1, %v3054_v37, %v3021_v32  ;;  %v3072_v61 = vpop.xlane.xlu0 %865  ;;  %v1025_v62 = vsel %vm1017_vm4, %v2486_v52, 2147483647 }
 0x36d   : > { %vm1152_vm5 = vcmp.ge.f32.partialorder %v3072_v61, %v3023_v1  ;;  %978 = vmin.xlane.f32.xlu1 %v3062_v44  ;;  %v3078_v13 = vcvt.s32.f32 %v961_v34  ;;  %v3081_v7 = vsel %vm486_vm2, %v1025_v62, 2147483647  ;;  %vm1016_vm7 = vcmp.eq.f32.partialorder %v2940_v19, %v3072_v61  ;;  %1178 = vst.msk [vmem:[%s2367_s24 + $0x8] sm:$0xff] %vm1176_vm14, %v1161_v15 }
 0x36e   : > { %v1160_v11 = vsel %vm1152_vm5, %v3072_v61, %v3023_v1  ;;  %v3092_v20 = vpop.xlane.xlu1 %880  ;;  %v1049_v30 = vshra.s32 %v3081_v7, 16  ;;  %v1024_v33 = vsel %vm1016_vm7, %v2496_v55, 2147483647 }
 0x36f   : > { %vm1157_vm6 = vcmp.ge.f32.partialorder %v3092_v20, %v3036_v63  ;;  %964 = vmin.xlane.f32.xlu0 %v3078_v13  ;;  %v3100_v48 = vsel %vm486_vm2, %v1024_v33, 2147483647  ;;  %vm1021_vm8 = vcmp.eq.f32.partialorder %v2951_v22, %v3092_v20  ;;  %1177 = vst.msk [vmem:[%s2367_s24] sm:$0xff] %vm1176_vm14, %v1160_v11 }
 0x370   : > { %v1165_v40 = vsel %vm1157_vm6, %v3092_v20, %v3036_v63  ;;  %v3111_v18 = vpop.xlane.xlu0 %877  ;;  %v3113_v23 = vcvt.s32.f32 %v1049_v30  ;;  %v1034_v24 = vshra.s32 %v3100_v48, 16  ;;  %v1029_v43 = vsel %vm1021_vm8, %v2536_v6, 2147483647 }
 0x371   : > { %vm1156_vm11 = vcmp.ge.f32.partialorder %v3111_v18, %v3043_v49  ;;  %v3120_v53 = vsel %vm486_vm2, %v1029_v43, 2147483647  ;;  %vm1020_vm15 = vcmp.eq.f32.partialorder %v2959_v35, %v3111_v18  ;;  %1182 = vst.msk [vmem:[%s2367_s24 + $0x28] sm:$0xff] %vm1176_vm14, %v1165_v40 }
 0x372   : > { %v1164_v56 = vsel %vm1156_vm11, %v3111_v18, %v3043_v49  ;;  %1052 = vmin.xlane.f32.xlu1 %v3113_v23  ;;  %v3132_v28 = vpop.xlane.xlu1 %854  ;;  %v3134_v16 = vcvt.s32.f32 %v1034_v24  ;;  %v1109_v2 = vshra.s32 %v3120_v53, 16  ;;  %v1028_v45 = vsel %vm1020_vm15, %v2543_v8, 2147483647 }
 0x373   : > { %4508 = vst [vmem:[#allocation22_spill] sm:$0xff] %v3132_v28  ;;  %v3139_v4 = vsel %vm486_vm2, %v1028_v45, 2147483647  ;;  %vm891_vm9 = vcmp.eq.f32.partialorder %v2976_v38, %v3132_v28  ;;  %1181 = vst.msk [vmem:[%s2367_s24 + $0x20] sm:$0xff] %vm1176_vm14, %v1164_v56 }
 0x374   : > { %1037 = vmin.xlane.f32.xlu0 %v3134_v16  ;;  %v3146_v54 = vpop.xlane.xlu0 %852  ;;  %v3148_v3 = vcvt.s32.f32 %v1109_v2  ;;  %v1094_v26 = vshra.s32 %v3139_v4, 16  ;;  %v3152_v14 = vsel %vm891_vm9, %v2593_v39, 2147483647 }
 0x375   : > { %4509 = vst [vmem:[#allocation4_spill] sm:$0xff] %v3146_v54  ;;  %v947_v34 = vshra.s32 %v3152_v14, 16  ;;  %vm890_vm13 = vcmp.eq.f32.partialorder %v2989_v50, %v3146_v54 }
 0x376   : > { %1112 = vmin.xlane.f32.xlu1 %v3148_v3  ;;  %v3158_v15 = vpop.xlane.xlu1 %874  ;;  %v3160_v62 = vcvt.s32.f32 %v1094_v26  ;;  %v3163_v11 = vsel %vm890_vm13, %v2593_v39, 2147483647 }
 0x377   : > { %vm1155_vm0 = vcmp.ge.f32.partialorder %v3158_v15, %v3132_v28  ;;  %v3167_v30 = vcvt.s32.f32 %v947_v34  ;;  %v933_v33 = vshra.s32 %v3163_v11, 16  ;;  %vm1019_vm12 = vcmp.eq.f32.partialorder %v2984_v41, %v3158_v15 }
 0x378   : > { %v1163_v40 = vsel %vm1155_vm0, %v3158_v15, %v3132_v28  ;;  %1097 = vmin.xlane.f32.xlu0 %v3160_v62  ;;  %v3176_v24 = vpop.xlane.xlu0 %871  ;;  %v1027_v26 = vsel %vm1019_vm12, %v4484_v42, 2147483647  ;;  %v904_v41 = vand.u32 65535, %v3034_v0 }
 0x379   : > { %4510 = vst [vmem:[#allocation13_spill] sm:$0xff] %v3176_v24  ;;  %vm1154_vm10 = vcmp.ge.f32.partialorder %v3176_v24, %v3146_v54  ;;  %v3180_v43 = vcvt.s32.f32 %v933_v33  ;;  %1180 = vst.msk [vmem:[%s2367_s24 + $0x18] sm:$0xff] %vm1176_vm14, %v1163_v40  ;;  %vm1018_vm3 = vcmp.eq.f32.partialorder %v2994_v31, %v3176_v24 }
 0x37a   : > { %v1162_v56 = vsel %vm1154_vm10, %v3176_v24, %v3146_v54  ;;  %950 = vmin.xlane.f32.xlu1 %v3167_v30  ;;  %v3190_v2 = vpop.xlane.xlu1 %886  ;;  %v1026_v33 = vsel %vm1018_vm3, %v4489_v47, 2147483647  ;;  %v974_v24 = vand.u32 65535, %v3048_v29  ;;  %v1048_v29 = vand.u32 65535, %v3081_v7 }
 0x37b   : > { %4511 = vst [vmem:[#allocation3_spill] sm:$0xff] %v3190_v2  ;;  %1179 = vst.msk [vmem:[%s2367_s24 + $0x10] sm:$0xff] %vm1176_vm14, %v1162_v56  ;;  %vm1023_vm4 = vcmp.eq.f32.partialorder %v3000_v60, %v3190_v2  ;;  %v3222_v60 = vsel %vm486_vm2, %v1027_v26, 2147483647 }
 0x37c   : > { %936 = vmin.xlane.f32.xlu0 %v3180_v43  ;;  %v3197_v45 = vpop.xlane.xlu0 %883  ;;  %v1031_v50 = vsel %vm1023_vm4, %v4496_v21, 2147483647  ;;  %v1079_v21 = vshra.s32 %v3222_v60, 16 }
 0x37d   : > { %4512 = vst [vmem:[#allocation7_spill] sm:$0xff] %v3197_v45  ;;  %vm1022_vm15 = vcmp.eq.f32.partialorder %v3005_v36, %v3197_v45  ;;  %v3253_v47 = vsel %vm486_vm2, %v1031_v50, 2147483647 }
 0x37e   : > { %v3202_v34 = vpop.xlane.xlu1 %862 }
 0x37f   : > { %4513 = vst [vmem:[#allocation8_spill] sm:$0xff] %v3202_v34  ;;  %vm1159_vm7 = vcmp.ge.f32.partialorder %v3190_v2, %v3202_v34  ;;  %vm895_vm8 = vcmp.eq.f32.partialorder %v3014_v27, %v3202_v34 }
 0x380   : > { %v1167_v40 = vsel %vm1159_vm7, %v3190_v2, %v3202_v34  ;;  %v3216_v56 = vpop.xlane.xlu0 %860  ;;  %v3219_v31 = vsel %vm895_vm8, %v2593_v39, 2147483647  ;;  %v3243_v34 = vsel %vm486_vm2, %v1026_v33, 2147483647 }
 0x381   : > { %4514 = vst [vmem:[#allocation11_spill] sm:$0xff] %v3216_v56  ;;  %vm1158_vm9 = vcmp.ge.f32.partialorder %v3197_v45, %v3216_v56  ;;  %v1003_v27 = vshra.s32 %v3219_v31, 16  ;;  %vm894_vm13 = vcmp.eq.f32.partialorder %v3018_v17, %v3216_v56  ;;  %1184 = vst.msk [vmem:[%s2367_s24 + $0x38] sm:$0xff] %vm1176_vm14, %v1167_v40  ;;  %v1030_v40 = vsel %vm1022_vm15, %v4499_v59, 2147483647 }
 0x382   : > { %v1166_v26 = vsel %vm1158_vm9, %v3197_v45, %v3216_v56  ;;  %v3240_v36 = vsel %vm894_vm13, %v2593_v39, 2147483647  ;;  %v1064_v33 = vshra.s32 %v3243_v34, 16  ;;  %v3263_v45 = vcvt.s32.f32 %v1079_v21 }
 0x383   : > { %v3245_v2 = vcvt.s32.f32 %v1003_v27  ;;  %v989_v17 = vshra.s32 %v3240_v36, 16  ;;  %1183 = vst.msk [vmem:[%s2367_s24 + $0x30] sm:$0xff] %vm1176_vm14, %v1166_v26  ;;  %v3260_v27 = vsel %vm486_vm2, %v1030_v40, 2147483647  ;;  %v1139_v59 = vshra.s32 %v3253_v47, 16 }
 0x384   : > { %v3267_v26 = vcvt.s32.f32 %v1064_v33  ;;  %v1124_v50 = vshra.s32 %v3260_v27, 16  ;;  %v918_v21 = vand.u32 65535, %v3028_v9 }
 0x385   : > { %1006 = vmin.xlane.f32.xlu1 %v3245_v2  ;;  %v3256_v56 = vcvt.s32.f32 %v989_v17  ;;  %v3271_v17 = vcvt.s32.f32 %v1139_v59  ;;  %v906_v59 = vcvt.s32.f32 %v904_v41 }
 0x386   : > { %v3274_v40 = vcvt.s32.f32 %v1124_v50  ;;  %v920_v33 = vcvt.s32.f32 %v918_v21  ;;  %v960_v50 = vand.u32 65535, %v3058_v57  ;;  %v976_v21 = vcvt.s32.f32 %v974_v24 }
 0x387   : > { %992 = vmin.xlane.f32.xlu0 %v3256_v56  ;;  %v1050_v24 = vcvt.s32.f32 %v1048_v29 }
 0x389   : > { %1082 = vmin.xlane.f32.xlu1 %v3263_v45 }
 0x38b   : > { %1067 = vmin.xlane.f32.xlu0 %v3267_v26 }
 0x38d   : > { %1142 = vmin.xlane.f32.xlu1 %v3271_v17 }
 0x38f   : > { %1127 = vmin.xlane.f32.xlu0 %v3274_v40 }
 0x3f6   : > { %v3279_v54 = vpop.xlane.xlu1 %922 }
 0x3f7   : > { %v3282_v38 = vpop.xlane.xlu0 %908  ;;  %vm924_vm12 = vcmp.eq.f32.partialorder %v3039_v10, %v3279_v54  ;;  %v962_v10 = vcvt.s32.f32 %v960_v50  ;;  %v1093_v50 = vand.u32 65535, %v3139_v4  ;;  %v932_v4 = vand.u32 65535, %v3163_v11 }
 0x3f8   : > { %v925_v42 = vsel %vm924_vm12, %v920_v33, inf  ;;  %vm910_vm3 = vcmp.eq.f32.partialorder %v3045_v25, %v3282_v38  ;;  %v1108_v33 = vand.u32 65535, %v3120_v53 }
 0x3f9   : > { %926 = vmin.xlane.f32.xlu1 %v925_v42  ;;  %v911_v9 = vsel %vm910_vm3, %v906_v59, inf  ;;  %v1033_v42 = vand.u32 65535, %v3100_v48  ;;  %v1095_v29 = vcvt.s32.f32 %v1093_v50 }
 0x3fa   : > { %v3289_v0 = vpop.xlane.xlu1 %978  ;;  %912 = vmin.xlane.f32.xlu0 %v911_v9  ;;  %v1110_v9 = vcvt.s32.f32 %v1108_v33 }
 0x3fb   : > { %vm980_vm4 = vcmp.eq.f32.partialorder %v3062_v44, %v3289_v0  ;;  %v1035_v59 = vcvt.s32.f32 %v1033_v42  ;;  %v934_v42 = vcvt.s32.f32 %v932_v4 }
 0x3fc   : > { %v3294_v28 = vpop.xlane.xlu0 %964  ;;  %v981_v41 = vsel %vm980_vm4, %v976_v21, inf  ;;  %v946_v21 = vand.u32 65535, %v3152_v14 }
 0x3fd   : > { %982 = vmin.xlane.f32.xlu1 %v981_v41  ;;  %vm966_vm8 = vcmp.eq.f32.partialorder %v3078_v13, %v3294_v28 }
 0x3fe   : > { %v967_v25 = vsel %vm966_vm8, %v962_v10, inf  ;;  %v948_v10 = vcvt.s32.f32 %v946_v21 }
 0x3ff   : > { %968 = vmin.xlane.f32.xlu0 %v967_v25  ;;  %v3299_v57 = vpop.xlane.xlu1 %1052  ;;  %v988_v25 = vand.u32 65535, %v3240_v36 }
 0x400   : > { %vm1054_vm15 = vcmp.eq.f32.partialorder %v3113_v23, %v3299_v57 }
 0x401   : > { %v3304_v44 = vpop.xlane.xlu0 %1037  ;;  %v1055_v7 = vsel %vm1054_vm15, %v1050_v24, inf  ;;  %v990_v50 = vcvt.s32.f32 %v988_v25 }
 0x402   : > { %1056 = vmin.xlane.f32.xlu1 %v1055_v7  ;;  %vm1039_vm13 = vcmp.eq.f32.partialorder %v3134_v16, %v3304_v44  ;;  %v1078_v7 = vand.u32 65535, %v3222_v60 }
 0x403   : > { %v3309_v13 = vpop.xlane.xlu1 %1112  ;;  %v1040_v48 = vsel %vm1039_vm13, %v1035_v59, inf }
 0x404   : > { %1041 = vmin.xlane.f32.xlu0 %v1040_v48  ;;  %vm1114_vm12 = vcmp.eq.f32.partialorder %v3148_v3, %v3309_v13  ;;  %v1080_v48 = vcvt.s32.f32 %v1078_v7  ;;  %v1119_v7 = vcvt.f32.s32 %v3309_v13 }
 0x405   : > { %v3314_v23 = vpop.xlane.xlu0 %1097  ;;  %v1115_v53 = vsel %vm1114_vm12, %v1110_v9, inf  ;;  %v1138_v9 = vand.u32 65535, %v3253_v47 }
 0x406   : > { %1116 = vmin.xlane.f32.xlu1 %v1115_v53  ;;  %vm1099_vm3 = vcmp.eq.f32.partialorder %v3160_v62, %v3314_v23  ;;  %v1002_v62 = vand.u32 65535, %v3219_v31 }
 0x407   : > { %v3319_v16 = vpop.xlane.xlu1 %950  ;;  %v1100_v41 = vsel %vm1099_vm3, %v1095_v29, inf  ;;  %v1140_v29 = vcvt.s32.f32 %v1138_v9 }
 0x408   : > { %1101 = vmin.xlane.f32.xlu0 %v1100_v41  ;;  %vm952_vm4 = vcmp.eq.f32.partialorder %v3167_v30, %v3319_v16  ;;  %v1004_v33 = vcvt.s32.f32 %v1002_v62  ;;  %v1044_v62 = vcvt.f32.s32 %v3304_v44 }
 0x409   : > { %v3323_v14 = vpop.xlane.xlu0 %936  ;;  %v953_v3 = vsel %vm952_vm4, %v948_v10, inf }
 0x40a   : > { %954 = vmin.xlane.f32.xlu1 %v953_v3  ;;  %vm938_vm8 = vcmp.eq.f32.partialorder %v3180_v43, %v3323_v14  ;;  %v1063_v43 = vand.u32 65535, %v3243_v34  ;;  %v1123_v34 = vand.u32 65535, %v3260_v27  ;;  %v929_v3 = vcvt.f32.s32 %v3279_v54 }
 0x40b   : > { %v939_v11 = vsel %vm938_vm8, %v934_v42, inf  ;;  %v1059_v42 = vcvt.f32.s32 %v3299_v57  ;;  %v971_v54 = vcvt.f32.s32 %v3294_v28  ;;  %v1104_v57 = vcvt.f32.s32 %v3314_v23 }
 0x40c   : > { %940 = vmin.xlane.f32.xlu0 %v939_v11  ;;  %v1065_v21 = vcvt.s32.f32 %v1063_v43  ;;  %v1125_v4 = vcvt.s32.f32 %v1123_v34 }
 0x40d   : > { %v972_v23 = vshll.u32 %v971_v54, 16 }
 0x412   : > { %v3329_v24 = vpop.xlane.xlu1 %1006 }
 0x413   : > { %vm1008_vm15 = vcmp.eq.f32.partialorder %v3245_v2, %v3329_v24 }
 0x414   : > { %v3334_v30 = vpop.xlane.xlu0 %992  ;;  %v1009_v59 = vsel %vm1008_vm15, %v1004_v33, inf  ;;  %v985_v33 = vcvt.f32.s32 %v3289_v0 }
 0x415   : > { %1010 = vmin.xlane.f32.xlu1 %v1009_v59  ;;  %vm994_vm13 = vcmp.eq.f32.partialorder %v3256_v56, %v3334_v30  ;;  %v930_v59 = vshll.u32 %v929_v3, 16 }
 0x416   : > { %v3339_v31 = vpop.xlane.xlu1 %1082  ;;  %v995_v36 = vsel %vm994_vm13, %v990_v50, inf  ;;  %v1060_v50 = vshll.u32 %v1059_v42, 16  ;;  %v986_v0 = vshll.u32 %v985_v33, 16 }
 0x417   : > { %996 = vmin.xlane.f32.xlu0 %v995_v36  ;;  %vm1084_vm12 = vcmp.eq.f32.partialorder %v3263_v45, %v3339_v31 }
 0x418   : > { %v3344_v60 = vpop.xlane.xlu0 %1067  ;;  %v1085_v2 = vsel %vm1084_vm12, %v1080_v48, inf }
 0x419   : > { %1086 = vmin.xlane.f32.xlu1 %v1085_v2  ;;  %vm1069_vm3 = vcmp.eq.f32.partialorder %v3267_v26, %v3344_v60 }
 0x41a   : > { %v3349_v56 = vpop.xlane.xlu1 %1142  ;;  %v1070_v53 = vsel %vm1069_vm3, %v1065_v21, inf }
 0x41b   : > { %1071 = vmin.xlane.f32.xlu0 %v1070_v53  ;;  %vm1144_vm4 = vcmp.eq.f32.partialorder %v3271_v17, %v3349_v56  ;;  %v915_v17 = vcvt.f32.s32 %v3282_v38  ;;  %v1045_v38 = vshll.u32 %v1044_v62, 16  ;;  %v1120_v53 = vshll.u32 %v1119_v7, 16 }
 0x41c   : > { %v3353_v47 = vpop.xlane.xlu0 %1127  ;;  %v1145_v45 = vsel %vm1144_vm4, %v1140_v29, inf  ;;  %v957_v7 = vcvt.f32.s32 %v3319_v16  ;;  %v1149_v54 = vcvt.f32.s32 %v3349_v56 }
 0x41d   : > { %1146 = vmin.xlane.f32.xlu1 %v1145_v45  ;;  %vm1129_vm8 = vcmp.eq.f32.partialorder %v3274_v40, %v3353_v47  ;;  %v916_v48 = vshll.u32 %v915_v17, 16 }
 0x41e   : > { %v1130_v27 = vsel %vm1129_vm8, %v1125_v4, inf }
 0x41f   : > { %1131 = vmin.xlane.f32.xlu0 %v1130_v27 }
 0x486   : > { %v927_v41 = vpop.xlane.xlu1 %926 }
 0x487   : > { %v913_v26 = vpop.xlane.xlu0 %912  ;;  %v928_v25 = vcvt.f32.s32 %v927_v41  ;;  %v1105_v41 = vshll.u32 %v1104_v57, 16 }
 0x488   : > { %v914_v43 = vcvt.f32.s32 %v913_v26 }
 0x489   : > { %v931_v21 = vadd.s32 %v930_v59, %v928_v25 }
 0x48a   : > { %v983_v10 = vpop.xlane.xlu1 %982  ;;  %v917_v45 = vadd.s32 %v916_v48, %v914_v43  ;;  %v1074_v43 = vcvt.f32.s32 %v3344_v60  ;;  %v999_v48 = vcvt.f32.s32 %v3334_v30  ;;  %v1150_v30 = vshll.u32 %v1149_v54, 16 }
 0x48b   : > { %v984_v9 = vcvt.f32.s32 %v983_v10 }
 0x48c   : > { %v969_v11 = vpop.xlane.xlu0 %968 }
 0x48d   : > { %v970_v13 = vcvt.f32.s32 %v969_v11  ;;  %v987_v26 = vadd.s32 %v986_v0, %v984_v9 }
 0x48f   : > { %v1057_v40 = vpop.xlane.xlu1 %1056  ;;  %v973_v32 = vadd.s32 %v972_v23, %v970_v13  ;;  %v1000_v13 = vshll.u32 %v999_v48, 16 }
 0x490   : > { %v1058_v36 = vcvt.f32.s32 %v1057_v40  ;;  %v1089_v40 = vcvt.f32.s32 %v3339_v31  ;;  %v958_v31 = vshll.u32 %v957_v7, 16 }
 0x491   : > { %v1042_v2 = vpop.xlane.xlu0 %1041 }
 0x492   : > { %v1061_v44 = vadd.s32 %v1060_v50, %v1058_v36  ;;  %v1043_v34 = vcvt.f32.s32 %v1042_v2  ;;  %v1090_v9 = vshll.u32 %v1089_v40, 16  ;;  %v4526_v40 = vld [vmem:[#allocation19_spill] sm:$0xff] }
 0x493   : > { %v1117_v29 = vpop.xlane.xlu1 %1116 }
 0x494   : > { %v1046_v4 = vadd.s32 %v1045_v38, %v1043_v34  ;;  %v1118_v27 = vcvt.f32.s32 %v1117_v29  ;;  %v1169_v28 = vsel %vm1153_vm1, %v1061_v44, %v931_v21  ;;  %v1134_v38 = vcvt.f32.s32 %v3353_v47 }
 0x495   : > { %v1102_v10 = vpop.xlane.xlu0 %1101  ;;  %vm1194_vm15 = vcmp.eq.s32.totalorder %v2593_v39, %v1169_v28  ;;  %1186 = vst.msk [vmem:[%s2372_s12 + $0x8] sm:$0xff] %vm1176_vm14, %v1169_v28  ;;  %vm1210_vm13 = vcmp.eq.s32.totalorder %v2486_v52, %v1169_v28  ;;  %v1075_v34 = vshll.u32 %v1074_v43, 16  ;;  %v4530_v43 = vld [vmem:[#allocation18_spill] sm:$0xff] }
 0x496   : > { %v1121_v3 = vadd.s32 %v1120_v53, %v1118_v27  ;;  %v1103_v42 = vcvt.f32.s32 %v1102_v10  ;;  %v3372_v11 = vsel %vm1194_vm15, -inf, %v2892_v12  ;;  %v1168_v17 = vsel %vm1152_vm5, %v1046_v4, %v917_v45  ;;  %v4516_v10 = vld [vmem:[#allocation12_spill] sm:$0xff] }
 0x497   : > { %1227 = vmax.xlane.f32.xlu1 %v3372_v11  ;;  %vm1193_vm1 = vcmp.eq.s32.totalorder %v2593_v39, %v1168_v17  ;;  %1185 = vst.msk [vmem:[%s2372_s12] sm:$0xff] %vm1176_vm14, %v1168_v17  ;;  %vm1209_vm12 = vcmp.eq.s32.totalorder %v2496_v55, %v1168_v17  ;;  %v3404_v63 = vsel %vm1210_vm13, -inf, %v2928_v51  ;;  %v955_v49 = vpop.xlane.xlu1 %954  ;;  %v1135_v23 = vshll.u32 %v1134_v38, 16  ;;  %v4517_v17 = vld [vmem:[#allocation5_spill] sm:$0xff] }
 0x498   : > { %v1106_v37 = vadd.s32 %v1105_v41, %v1103_v42  ;;  %v3382_v62 = vsel %vm1193_vm1, -inf, %v2901_v46  ;;  %v1173_v12 = vsel %vm1157_vm6, %v1121_v3, %v987_v26  ;;  %v1244_v20 = vsel %vm486_vm2, %v3404_v63, -inf }
 0x499   : > { %1225 = vmax.xlane.f32.xlu0 %v3382_v62  ;;  %vm1198_vm5 = vcmp.eq.s32.totalorder %v2593_v39, %v1173_v12  ;;  %1190 = vst.msk [vmem:[%s2372_s12 + $0x28] sm:$0xff] %vm1176_vm14, %v1173_v12  ;;  %vm1214_vm3 = vcmp.eq.s32.totalorder %v2536_v6, %v1173_v12  ;;  %v941_v18 = vpop.xlane.xlu0 %940  ;;  %v956_v36 = vcvt.f32.s32 %v955_v49 }
 0x49a   : > { %v3393_v1 = vsel %vm1198_vm5, -inf, %v2915_v58  ;;  %v1172_v46 = vsel %vm1156_vm11, %v1106_v37, %v973_v32  ;;  %v3412_v58 = vsel %vm1209_vm12, -inf, %v2940_v19  ;;  %v3418_v51 = vsel %vm1214_vm3, -inf, %v2951_v22 }
 0x49b   : > { %1235 = vmax.xlane.f32.xlu1 %v3393_v1  ;;  %vm1197_vm6 = vcmp.eq.s32.totalorder %v2593_v39, %v1172_v46  ;;  %1189 = vst.msk [vmem:[%s2372_s12 + $0x20] sm:$0xff] %vm1176_vm14, %v1172_v46  ;;  %vm1213_vm11 = vcmp.eq.s32.totalorder %v2543_v8, %v1172_v46  ;;  %v1256_v33 = vsel %vm486_vm2, %v3418_v51, -inf  ;;  %v943_v22 = vcvt.f32.s32 %v3323_v14  ;;  %v4521_v46 = vld [vmem:[#allocation9_spill] sm:$0xff] }
 0x49c   : > { %v3407_v61 = vsel %vm1197_vm6, -inf, %v2932_v5  ;;  %v1241_v5 = vsel %vm486_vm2, %v3412_v58, -inf  ;;  %v3423_v25 = vsel %vm1213_vm11, -inf, %v2959_v35  ;;  %v1013_v35 = vcvt.f32.s32 %v3329_v24 }
 0x49d   : > { %1233 = vmax.xlane.f32.xlu0 %v3407_v61  ;;  %v1253_v50 = vsel %vm486_vm2, %v3423_v25, -inf  ;;  %v942_v16 = vcvt.f32.s32 %v941_v18  ;;  %v944_v14 = vshll.u32 %v943_v22, 16  ;;  %v959_v60 = vadd.s32 %v958_v31, %v956_v36  ;;  %v4535_v31 = vld [vmem:[#allocation20_spill] sm:$0xff] }
 0x49e   : > { %v1014_v24 = vshll.u32 %v1013_v35, 16  ;;  %vm1553_vm6 = vcmask 23568  }
 0x49f   : > { %1245 = vmax.xlane.f32.xlu1 %v1244_v20  ;;  %v945_v29 = vadd.s32 %v944_v14, %v942_v16  ;;  %v4523_v20 = vld [vmem:[#allocation15_spill] sm:$0xff]  ;;  %v4533_v16 = vld [vmem:[#allocation16_spill] sm:$0xff] }
 0x4a1   : > { %1242 = vmax.xlane.f32.xlu0 %v1241_v5 }
 0x4a2   : > { %v1011_v19 = vpop.xlane.xlu1 %1010 }
 0x4a3   : > { %1257 = vmax.xlane.f32.xlu1 %v1256_v33  ;;  %v1012_v21 = vcvt.f32.s32 %v1011_v19 }
 0x4a4   : > { %v997_v59 = vpop.xlane.xlu0 %996 }
 0x4a5   : > { %1254 = vmax.xlane.f32.xlu0 %v1253_v50  ;;  %v998_v45 = vcvt.f32.s32 %v997_v59  ;;  %v1015_v41 = vadd.s32 %v1014_v24, %v1012_v21  ;;  %v4528_v59 = vld [vmem:[#allocation6_spill] sm:$0xff] }
 0x4a6   : > { %v1087_v57 = vpop.xlane.xlu1 %1086 }
 0x4a7   : > { %v1088_v2 = vcvt.f32.s32 %v1087_v57  ;;  %v1001_v18 = vadd.s32 %v1000_v13, %v998_v45 }
 0x4a8   : > { %v1072_v44 = vpop.xlane.xlu0 %1071 }
 0x4a9   : > { %v1091_v0 = vadd.s32 %v1090_v9, %v1088_v2  ;;  %v1073_v53 = vcvt.f32.s32 %v1072_v44  ;;  %v4536_v2 = vld [vmem:[#allocation21_spill] sm:$0xff]  ;;  %v4538_v44 = vld [vmem:[#allocation10_spill] sm:$0xff] }
 0x4aa   : > { %v1147_v56 = vpop.xlane.xlu1 %1146 }
 0x4ab   : > { %v1076_v4 = vadd.s32 %v1075_v34, %v1073_v53  ;;  %v1148_v27 = vcvt.f32.s32 %v1147_v56  ;;  %v1171_v47 = vsel %vm1155_vm0, %v1091_v0, %v959_v60  ;;  %v4540_v60 = vld [vmem:[#allocation17_spill] sm:$0xff] }
 0x4ac   : > { %v1132_v26 = vpop.xlane.xlu0 %1131  ;;  %vm1196_vm4 = vcmp.eq.s32.totalorder %v2593_v39, %v1171_v47  ;;  %1188 = vst.msk [vmem:[%s2372_s12 + $0x18] sm:$0xff] %vm1176_vm14, %v1171_v47  ;;  %vm1212_vm8 = vcmp.eq.s32.totalorder %v4516_v10, %v1171_v47 }
 0x4ad   : > { %v1151_v3 = vadd.s32 %v1150_v30, %v1148_v27  ;;  %v1133_v42 = vcvt.f32.s32 %v1132_v26  ;;  %v3445_v32 = vsel %vm1196_vm4, -inf, %v4517_v17  ;;  %v1170_v15 = vsel %vm1154_vm10, %v1076_v4, %v945_v29 }
 0x4ae   : > { %4518 = vst [vmem:[#allocation14_spill] sm:$0xff] %v3445_v32  ;;  %1231 = vmax.xlane.f32.xlu1 %v3445_v32  ;;  %vm1195_vm0 = vcmp.eq.s32.totalorder %v2593_v39, %v1170_v15  ;;  %1187 = vst.msk [vmem:[%s2372_s12 + $0x10] sm:$0xff] %vm1176_vm14, %v1170_v15  ;;  %v3455_v49 = vsel %vm1212_vm8, -inf, %v4521_v46  ;;  %vm1211_vm15 = vcmp.eq.s32.totalorder %v4523_v20, %v1170_v15 }
 0x4af   : > { %4522 = vst [vmem:[#allocation22_spill] sm:$0xff] %v3455_v49  ;;  %v1175_v33 = vsel %vm1159_vm7, %v1151_v3, %v1015_v41  ;;  %v1136_v7 = vadd.s32 %v1135_v23, %v1133_v42  ;;  %v3462_v22 = vsel %vm1195_vm0, -inf, %v4526_v40  ;;  %v3468_v50 = vsel %vm1211_vm15, -inf, %v4528_v59 }
 0x4b0   : > { %4527 = vst [vmem:[#allocation5_spill] sm:$0xff] %v3462_v22  ;;  %1192 = vst.msk [vmem:[%s2372_s12 + $0x38] sm:$0xff] %vm1176_vm14, %v1175_v33  ;;  %1229 = vmax.xlane.f32.xlu0 %v3462_v22  ;;  %vm1216_vm10 = vcmp.eq.s32.totalorder %v4530_v43, %v1175_v33  ;;  %v1250_v54 = vsel %vm486_vm2, %v3455_v49, -inf  ;;  %v1247_v9 = vsel %vm486_vm2, %v3468_v50, -inf }
 0x4b1   : > { %4529 = vst [vmem:[#allocation13_spill] sm:$0xff] %v3468_v50  ;;  %v1174_v48 = vsel %vm1158_vm9, %v1136_v7, %v1001_v18  ;;  %v3479_v57 = vsel %vm1216_vm10, -inf, %v4533_v16  ;;  %vm1200_vm9 = vcmp.eq.s32.totalorder %v2593_v39, %v1175_v33 }
 0x4b2   : > { %1191 = vst.msk [vmem:[%s2372_s12 + $0x30] sm:$0xff] %vm1176_vm14, %v1174_v48  ;;  %1251 = vmax.xlane.f32.xlu1 %v1250_v54  ;;  %4534 = vst [vmem:[#allocation4_spill] sm:$0xff] %v3479_v57  ;;  %vm1215_vm7 = vcmp.eq.s32.totalorder %v4535_v31, %v1174_v48  ;;  %v1262_v38 = vsel %vm486_vm2, %v3479_v57, -inf  ;;  %vm1199_vm14 = vcmp.eq.s32.totalorder %v2593_v39, %v1174_v48  ;;  %v3494_v34 = vsel %vm1200_vm9, -inf, %v4538_v44 }
 0x4b3   : > { %v3485_v14 = vsel %vm1215_vm7, -inf, %v4536_v2  ;;  %4539 = vst [vmem:[#allocation3_spill] sm:$0xff] %v3494_v34  ;;  %v3498_v0 = vsel %vm1199_vm14, -inf, %v4540_v60 }
 0x4b4   : > { %1248 = vmax.xlane.f32.xlu0 %v1247_v9  ;;  %4537 = vst [vmem:[#allocation9_spill] sm:$0xff] %v3485_v14  ;;  %v1259_v21 = vsel %vm486_vm2, %v3485_v14, -inf  ;;  %4541 = vst [vmem:[#allocation8_spill] sm:$0xff] %v3498_v0 }
 0x4b6   : > { %1263 = vmax.xlane.f32.xlu1 %v1262_v38 }
 0x4b8   : > { %1260 = vmax.xlane.f32.xlu0 %v1259_v21 }
 0x4ba   : > { %1239 = vmax.xlane.f32.xlu1 %v3494_v34 }
 0x4bc   : > { %1237 = vmax.xlane.f32.xlu0 %v3498_v0 }
 0x524   : > { %v3501_v53 = vpop.xlane.xlu1 %1227 }
 0x525   : > { %vm1266_vm1 = vcmp.eq.f32.partialorder %v3372_v11, %v3501_v53 }
 0x526   : > { %v3506_v24 = vsel %vm1266_vm1, %v2593_v39, 2147483647  ;;  %v3508_v13 = vpop.xlane.xlu0 %1225 }
 0x527   : > { %vm1265_vm13 = vcmp.eq.f32.partialorder %v3382_v62, %v3508_v13  ;;  %v1296_v30 = vshra.s32 %v3506_v24, 16 }
 0x528   : > { %v3514_v29 = vsel %vm1265_vm13, %v2593_v39, 2147483647  ;;  %v3516_v56 = vpop.xlane.xlu1 %1235 }
 0x529   : > { %vm1270_vm5 = vcmp.eq.f32.partialorder %v3393_v1, %v3516_v56  ;;  %v3520_v45 = vcvt.s32.f32 %v1296_v30  ;;  %v1282_v4 = vshra.s32 %v3514_v29, 16 }
 0x52a   : > { %v3524_v27 = vsel %vm1270_vm5, %v2593_v39, 2147483647  ;;  %v3526_v28 = vpop.xlane.xlu0 %1233 }
 0x52b   : > { %vm1269_vm12 = vcmp.eq.f32.partialorder %v3407_v61, %v3526_v28  ;;  %1299 = vmin.xlane.f32.xlu1 %v3520_v45  ;;  %v3531_v47 = vcvt.s32.f32 %v1282_v4  ;;  %v1352_v23 = vshra.s32 %v3524_v27, 16 }
 0x52c   : > { %v3535_v41 = vsel %vm1269_vm12, %v2593_v39, 2147483647  ;;  %v3537_v26 = vpop.xlane.xlu1 %1245 }
 0x52d   : > { %vm1394_vm3 = vcmp.eq.f32.partialorder %v3404_v63, %v3537_v26  ;;  %vm1530_vm11 = vcmp.ge.f32.partialorder %v3537_v26, %v3501_v53  ;;  %1285 = vmin.xlane.f32.xlu0 %v3531_v47  ;;  %v3544_v3 = vcvt.s32.f32 %v1352_v23  ;;  %v1338_v42 = vshra.s32 %v3535_v41, 16 }
 0x52e   : > { %v1402_v17 = vsel %vm1394_vm3, %v2486_v52, 2147483647  ;;  %v1538_v37 = vsel %vm1530_vm11, %v3537_v26, %v3501_v53  ;;  %v3553_v12 = vpop.xlane.xlu0 %1242 }
 0x52f   : > { %1555 = vst.msk [vmem:[%s2367_s24 + $0x8] sm:$0xff] %vm1553_vm6, %v1538_v37  ;;  %vm1393_vm4 = vcmp.eq.f32.partialorder %v3412_v58, %v3553_v12  ;;  %vm1529_vm8 = vcmp.ge.f32.partialorder %v3553_v12, %v3508_v13  ;;  %1355 = vmin.xlane.f32.xlu1 %v3544_v3  ;;  %v3562_v15 = vcvt.s32.f32 %v1338_v42  ;;  %v3565_v46 = vsel %vm486_vm2, %v1402_v17, 2147483647 }
 0x530   : > { %v1401_v18 = vsel %vm1393_vm4, %v2496_v55, 2147483647  ;;  %v1537_v5 = vsel %vm1529_vm8, %v3553_v12, %v3508_v13  ;;  %v3573_v19 = vpop.xlane.xlu1 %1257  ;;  %v1426_v33 = vshra.s32 %v3565_v46, 16 }
 0x531   : > { %1554 = vst.msk [vmem:[%s2367_s24] sm:$0xff] %vm1553_vm6, %v1537_v5  ;;  %vm1398_vm0 = vcmp.eq.f32.partialorder %v3418_v51, %v3573_v19  ;;  %vm1534_vm15 = vcmp.ge.f32.partialorder %v3573_v19, %v3516_v56  ;;  %1341 = vmin.xlane.f32.xlu0 %v3562_v15  ;;  %v3584_v7 = vsel %vm486_vm2, %v1401_v18, 2147483647 }
 0x532   : > { %v1406_v40 = vsel %vm1398_vm0, %v2536_v6, 2147483647  ;;  %v1542_v59 = vsel %vm1534_vm15, %v3573_v19, %v3516_v56  ;;  %v3592_v36 = vpop.xlane.xlu0 %1254  ;;  %v3594_v35 = vcvt.s32.f32 %v1426_v33  ;;  %v1411_v48 = vshra.s32 %v3584_v7, 16 }
 0x533   : > { %1559 = vst.msk [vmem:[%s2367_s24 + $0x28] sm:$0xff] %vm1553_vm6, %v1542_v59  ;;  %vm1397_vm10 = vcmp.eq.f32.partialorder %v3423_v25, %v3592_v36  ;;  %vm1533_vm7 = vcmp.ge.f32.partialorder %v3592_v36, %v3526_v28  ;;  %v3604_v54 = vsel %vm486_vm2, %v1406_v40, 2147483647 }
 0x534   : > { %v1405_v16 = vsel %vm1397_vm10, %v2543_v8, 2147483647  ;;  %v1541_v9 = vsel %vm1533_vm7, %v3592_v36, %v3526_v28  ;;  %1429 = vmin.xlane.f32.xlu1 %v3594_v35  ;;  %v3613_v2 = vcvt.s32.f32 %v1411_v48  ;;  %v1486_v38 = vshra.s32 %v3604_v54, 16 }
 0x535   : > { %1558 = vst.msk [vmem:[%s2367_s24 + $0x20] sm:$0xff] %vm1553_vm6, %v1541_v9  ;;  %v3619_v21 = vsel %vm486_vm2, %v1405_v16, 2147483647 }
 0x536   : > { %1414 = vmin.xlane.f32.xlu0 %v3613_v2  ;;  %v3622_v44 = vcvt.s32.f32 %v1486_v38  ;;  %v1471_v60 = vshra.s32 %v3619_v21, 16 }
 0x538   : > { %1489 = vmin.xlane.f32.xlu1 %v3622_v44  ;;  %v3626_v30 = vcvt.s32.f32 %v1471_v60 }
 0x53a   : > { %1474 = vmin.xlane.f32.xlu0 %v3626_v30 }
 0x53b   : > { %v3629_v4 = vpop.xlane.xlu1 %1231 }
 0x53c   : > { %4542 = vst [vmem:[#allocation19_spill] sm:$0xff] %v3629_v4  ;;  %vm1268_vm9 = vcmp.eq.f32.partialorder %v3445_v32, %v3629_v4 }
 0x53d   : > { %v3634_v23 = vsel %vm1268_vm9, %v2593_v39, 2147483647  ;;  %v3636_v42 = vpop.xlane.xlu0 %1229 }
 0x53e   : > { %4543 = vst [vmem:[#allocation6_spill] sm:$0xff] %v3636_v42  ;;  %vm1267_vm14 = vcmp.eq.f32.partialorder %v3462_v22, %v3636_v42  ;;  %v1324_v17 = vshra.s32 %v3634_v23, 16 }
 0x53f   : > { %v3642_v37 = vsel %vm1267_vm14, %v2593_v39, 2147483647  ;;  %v3644_v18 = vpop.xlane.xlu1 %1251 }
 0x540   : > { %vm1532_vm1 = vcmp.ge.f32.partialorder %v3644_v18, %v3629_v4  ;;  %v3648_v5 = vcvt.s32.f32 %v1324_v17  ;;  %v1310_v33 = vshra.s32 %v3642_v37, 16  ;;  %vm1396_vm5 = vcmp.eq.f32.partialorder %v3455_v49, %v3644_v18 }
 0x541   : > { %v1540_v40 = vsel %vm1532_vm1, %v3644_v18, %v3629_v4  ;;  %v3656_v59 = vpop.xlane.xlu0 %1248  ;;  %v1404_v60 = vsel %vm1396_vm5, %v4516_v10, 2147483647 }
 0x542   : > { %4544 = vst [vmem:[#allocation7_spill] sm:$0xff] %v3656_v59  ;;  %1557 = vst.msk [vmem:[%s2367_s24 + $0x18] sm:$0xff] %vm1553_vm6, %v1540_v40  ;;  %vm1531_vm13 = vcmp.ge.f32.partialorder %v3656_v59, %v3636_v42  ;;  %1327 = vmin.xlane.f32.xlu1 %v3648_v5  ;;  %v3663_v48 = vcvt.s32.f32 %v1310_v33  ;;  %vm1395_vm12 = vcmp.eq.f32.partialorder %v3468_v50, %v3656_v59 }
 0x543   : > { %v1539_v16 = vsel %vm1531_vm13, %v3656_v59, %v3636_v42  ;;  %v3672_v9 = vpop.xlane.xlu1 %1263  ;;  %v1403_v33 = vsel %vm1395_vm12, %v4523_v20, 2147483647  ;;  %v1351_v59 = vand.u32 65535, %v3524_v27 }
 0x544   : > { %4545 = vst [vmem:[#allocation11_spill] sm:$0xff] %v3672_v9  ;;  %1556 = vst.msk [vmem:[%s2367_s24 + $0x10] sm:$0xff] %vm1553_vm6, %v1539_v16  ;;  %1313 = vmin.xlane.f32.xlu0 %v3663_v48  ;;  %vm1400_vm3 = vcmp.eq.f32.partialorder %v3479_v57, %v3672_v9 }
 0x545   : > { %v3679_v38 = vpop.xlane.xlu0 %1260  ;;  %v1408_v50 = vsel %vm1400_vm3, %v4530_v43, 2147483647  ;;  %v3723_v43 = vsel %vm486_vm2, %v1403_v33, 2147483647  ;;  %v1353_v4 = vcvt.s32.f32 %v1351_v59 }
 0x546   : > { %4546 = vst [vmem:[#allocation16_spill] sm:$0xff] %v3679_v38  ;;  %vm1399_vm10 = vcmp.eq.f32.partialorder %v3485_v14, %v3679_v38  ;;  %v3733_v20 = vsel %vm486_vm2, %v1408_v50, 2147483647  ;;  %v1441_v33 = vshra.s32 %v3723_v43, 16 }
 0x547   : > { %v3684_v17 = vpop.xlane.xlu1 %1239 }
 0x548   : > { %4547 = vst [vmem:[#allocation21_spill] sm:$0xff] %v3684_v17  ;;  %vm1272_vm4 = vcmp.eq.f32.partialorder %v3494_v34, %v3684_v17  ;;  %vm1536_vm0 = vcmp.ge.f32.partialorder %v3672_v9, %v3684_v17  ;;  %v3704_v34 = vsel %vm486_vm2, %v1404_v60, 2147483647 }
 0x549   : > { %v3694_v40 = vsel %vm1272_vm4, %v2593_v39, 2147483647  ;;  %v1544_v16 = vsel %vm1536_vm0, %v3672_v9, %v3684_v17  ;;  %v3701_v57 = vpop.xlane.xlu0 %1237  ;;  %v1456_v9 = vshra.s32 %v3704_v34, 16 }
 0x54a   : > { %4548 = vst [vmem:[#allocation10_spill] sm:$0xff] %v3701_v57  ;;  %1561 = vst.msk [vmem:[%s2367_s24 + $0x38] sm:$0xff] %vm1553_vm6, %v1544_v16  ;;  %vm1271_vm9 = vcmp.eq.f32.partialorder %v3498_v0, %v3701_v57  ;;  %vm1535_vm14 = vcmp.ge.f32.partialorder %v3679_v38, %v3701_v57  ;;  %v1380_v14 = vshra.s32 %v3694_v40, 16  ;;  %v1407_v16 = vsel %vm1399_vm10, %v4535_v31, 2147483647 }
 0x54b   : > { %v3715_v22 = vsel %vm1271_vm9, %v2593_v39, 2147483647  ;;  %v1543_v60 = vsel %vm1535_vm14, %v3679_v38, %v3701_v57  ;;  %v3740_v57 = vsel %vm486_vm2, %v1407_v16, 2147483647  ;;  %v3747_v31 = vcvt.s32.f32 %v1441_v33 }
 0x54c   : > { %1560 = vst.msk [vmem:[%s2367_s24 + $0x30] sm:$0xff] %vm1553_vm6, %v1543_v60  ;;  %v3728_v0 = vcvt.s32.f32 %v1380_v14  ;;  %v1366_v17 = vshra.s32 %v3715_v22, 16  ;;  %v3743_v14 = vcvt.s32.f32 %v1456_v9  ;;  %v1516_v60 = vshra.s32 %v3733_v20, 16 }
 0x54d   : > { %v1501_v50 = vshra.s32 %v3740_v57, 16  ;;  %v1295_v9 = vand.u32 65535, %v3506_v24  ;;  %v1281_v38 = vand.u32 65535, %v3514_v29 }
 0x54e   : > { %1383 = vmin.xlane.f32.xlu1 %v3728_v0  ;;  %v3736_v49 = vcvt.s32.f32 %v1366_v17  ;;  %v3751_v17 = vcvt.s32.f32 %v1516_v60 }
 0x54f   : > { %v3754_v16 = vcvt.s32.f32 %v1501_v50  ;;  %v1297_v33 = vcvt.s32.f32 %v1295_v9  ;;  %v1283_v10 = vcvt.s32.f32 %v1281_v38  ;;  %v1337_v50 = vand.u32 65535, %v3535_v41 }
 0x550   : > { %1369 = vmin.xlane.f32.xlu0 %v3736_v49 }
 0x551   : > { %v1339_v38 = vcvt.s32.f32 %v1337_v50 }
 0x552   : > { %1459 = vmin.xlane.f32.xlu1 %v3743_v14 }
 0x554   : > { %1444 = vmin.xlane.f32.xlu0 %v3747_v31 }
 0x556   : > { %1519 = vmin.xlane.f32.xlu1 %v3751_v17 }
 0x558   : > { %1504 = vmin.xlane.f32.xlu0 %v3754_v16 }
 0x5b8   : > { %v3759_v42 = vpop.xlane.xlu1 %1299 }
 0x5b9   : > { %vm1301_vm5 = vcmp.eq.f32.partialorder %v3520_v45, %v3759_v42  ;;  %v1425_v45 = vand.u32 65535, %v3565_v46 }
 0x5ba   : > { %v3764_v60 = vpop.xlane.xlu0 %1285  ;;  %v1302_v32 = vsel %vm1301_vm5, %v1297_v33, inf  ;;  %v1470_v33 = vand.u32 65535, %v3619_v21 }
 0x5bb   : > { %vm1287_vm12 = vcmp.eq.f32.partialorder %v3531_v47, %v3764_v60  ;;  %1303 = vmin.xlane.f32.xlu1 %v1302_v32  ;;  %v1410_v32 = vand.u32 65535, %v3584_v7  ;;  %v1427_v41 = vcvt.s32.f32 %v1425_v45  ;;  %v1309_v45 = vand.u32 65535, %v3642_v37 }
 0x5bc   : > { %v3769_v24 = vpop.xlane.xlu1 %1355  ;;  %v1288_v29 = vsel %vm1287_vm12, %v1283_v10, inf  ;;  %v1365_v37 = vand.u32 65535, %v3715_v22 }
 0x5bd   : > { %vm1357_vm3 = vcmp.eq.f32.partialorder %v3544_v3, %v3769_v24  ;;  %1289 = vmin.xlane.f32.xlu0 %v1288_v29  ;;  %v1485_v3 = vand.u32 65535, %v3604_v54  ;;  %v1412_v59 = vcvt.s32.f32 %v1410_v32  ;;  %v1472_v29 = vcvt.s32.f32 %v1470_v33 }
 0x5be   : > { %v3774_v27 = vpop.xlane.xlu0 %1341  ;;  %v1358_v9 = vsel %vm1357_vm3, %v1353_v4, inf  ;;  %v1367_v33 = vcvt.s32.f32 %v1365_v37 }
 0x5bf   : > { %vm1343_vm4 = vcmp.eq.f32.partialorder %v3562_v15, %v3774_v27  ;;  %1359 = vmin.xlane.f32.xlu1 %v1358_v9  ;;  %v1487_v50 = vcvt.s32.f32 %v1485_v3 }
 0x5c0   : > { %v1344_v47 = vsel %vm1343_vm4, %v1339_v38, inf }
 0x5c1   : > { %1345 = vmin.xlane.f32.xlu0 %v1344_v47  ;;  %v3779_v10 = vpop.xlane.xlu1 %1429  ;;  %v1311_v47 = vcvt.s32.f32 %v1309_v45 }
 0x5c2   : > { %vm1431_vm10 = vcmp.eq.f32.partialorder %v3594_v35, %v3779_v10 }
 0x5c3   : > { %v3784_v46 = vpop.xlane.xlu0 %1414  ;;  %v1432_v4 = vsel %vm1431_vm10, %v1427_v41, inf }
 0x5c4   : > { %vm1416_vm9 = vcmp.eq.f32.partialorder %v3613_v2, %v3784_v46  ;;  %1433 = vmin.xlane.f32.xlu1 %v1432_v4  ;;  %v1323_v2 = vand.u32 65535, %v3634_v23  ;;  %v1379_v23 = vand.u32 65535, %v3694_v40  ;;  %v1455_v4 = vand.u32 65535, %v3704_v34 }
 0x5c5   : > { %v3789_v15 = vpop.xlane.xlu1 %1489  ;;  %v1417_v7 = vsel %vm1416_vm9, %v1412_v59, inf }
 0x5c6   : > { %vm1491_vm5 = vcmp.eq.f32.partialorder %v3622_v44, %v3789_v15  ;;  %1418 = vmin.xlane.f32.xlu0 %v1417_v7  ;;  %v1325_v38 = vcvt.s32.f32 %v1323_v2  ;;  %v1381_v3 = vcvt.s32.f32 %v1379_v23  ;;  %v1457_v7 = vcvt.s32.f32 %v1455_v4 }
 0x5c7   : > { %v3793_v54 = vpop.xlane.xlu0 %1474  ;;  %v1492_v35 = vsel %vm1491_vm5, %v1487_v50, inf  ;;  %v1515_v50 = vand.u32 65535, %v3733_v20  ;;  %v1421_v23 = vcvt.f32.s32 %v3784_v46 }
 0x5c8   : > { %vm1476_vm12 = vcmp.eq.f32.partialorder %v3626_v30, %v3793_v54  ;;  %1493 = vmin.xlane.f32.xlu1 %v1492_v35 }
 0x5c9   : > { %v1477_v21 = vsel %vm1476_vm12, %v1472_v29, inf }
 0x5ca   : > { %1478 = vmin.xlane.f32.xlu0 %v1477_v21  ;;  %v1517_v21 = vcvt.s32.f32 %v1515_v50 }
 0x5cf   : > { %v3799_v9 = vpop.xlane.xlu1 %1327 }
 0x5d0   : > { %vm1329_vm3 = vcmp.eq.f32.partialorder %v3648_v5, %v3799_v9 }
 0x5d1   : > { %v3803_v44 = vpop.xlane.xlu0 %1313  ;;  %v1330_v32 = vsel %vm1329_vm3, %v1325_v38, inf }
 0x5d2   : > { %vm1315_vm4 = vcmp.eq.f32.partialorder %v3663_v48, %v3803_v44  ;;  %1331 = vmin.xlane.f32.xlu1 %v1330_v32  ;;  %v1440_v48 = vand.u32 65535, %v3723_v43  ;;  %v1500_v43 = vand.u32 65535, %v3740_v57  ;;  %v1306_v32 = vcvt.f32.s32 %v3759_v42 }
 0x5d3   : > { %v1316_v30 = vsel %vm1315_vm4, %v1311_v47, inf  ;;  %v1436_v47 = vcvt.f32.s32 %v3779_v10  ;;  %v1348_v42 = vcvt.f32.s32 %v3774_v27  ;;  %v1481_v10 = vcvt.f32.s32 %v3793_v54 }
 0x5d4   : > { %1317 = vmin.xlane.f32.xlu0 %v1316_v30  ;;  %v1442_v35 = vcvt.s32.f32 %v1440_v48  ;;  %v1502_v2 = vcvt.s32.f32 %v1500_v43 }
 0x5d5   : > { %v1349_v54 = vshll.u32 %v1348_v42, 16 }
 0x5db   : > { %v3809_v41 = vpop.xlane.xlu1 %1383 }
 0x5dc   : > { %vm1385_vm10 = vcmp.eq.f32.partialorder %v3728_v0, %v3809_v41 }
 0x5dd   : > { %v3814_v5 = vpop.xlane.xlu0 %1369  ;;  %v1386_v59 = vsel %vm1385_vm10, %v1381_v3, inf  ;;  %v1362_v3 = vcvt.f32.s32 %v3769_v24 }
 0x5de   : > { %vm1371_vm9 = vcmp.eq.f32.partialorder %v3736_v49, %v3814_v5  ;;  %1387 = vmin.xlane.f32.xlu1 %v1386_v59  ;;  %v1307_v59 = vshll.u32 %v1306_v32, 16 }
 0x5df   : > { %v3819_v40 = vpop.xlane.xlu1 %1459  ;;  %v1372_v22 = vsel %vm1371_vm9, %v1367_v33, inf  ;;  %v1437_v33 = vshll.u32 %v1436_v47, 16  ;;  %v1363_v24 = vshll.u32 %v1362_v3, 16 }
 0x5e0   : > { %vm1461_vm5 = vcmp.eq.f32.partialorder %v3743_v14, %v3819_v40  ;;  %1373 = vmin.xlane.f32.xlu0 %v1372_v22 }
 0x5e1   : > { %v3824_v34 = vpop.xlane.xlu0 %1444  ;;  %v1462_v0 = vsel %vm1461_vm5, %v1457_v7, inf }
 0x5e2   : > { %vm1446_vm12 = vcmp.eq.f32.partialorder %v3747_v31, %v3824_v34  ;;  %1463 = vmin.xlane.f32.xlu1 %v1462_v0 }
 0x5e3   : > { %v3829_v49 = vpop.xlane.xlu1 %1519  ;;  %v1447_v29 = vsel %vm1446_vm12, %v1442_v35, inf }
 0x5e4   : > { %vm1521_vm3 = vcmp.eq.f32.partialorder %v3751_v17, %v3829_v49  ;;  %1448 = vmin.xlane.f32.xlu0 %v1447_v29  ;;  %v1292_v17 = vcvt.f32.s32 %v3764_v60  ;;  %v1422_v60 = vshll.u32 %v1421_v23, 16 }
 0x5e5   : > { %v3833_v20 = vpop.xlane.xlu0 %1504  ;;  %v1522_v14 = vsel %vm1521_vm3, %v1517_v21, inf }
 0x5e6   : > { %vm1506_vm4 = vcmp.eq.f32.partialorder %v3754_v16, %v3833_v20  ;;  %1523 = vmin.xlane.f32.xlu1 %v1522_v14  ;;  %v1496_v16 = vcvt.f32.s32 %v3789_v15  ;;  %v1293_v7 = vshll.u32 %v1292_v17, 16 }
 0x5e7   : > { %v1507_v57 = vsel %vm1506_vm4, %v1502_v2, inf }
 0x5e8   : > { %1508 = vmin.xlane.f32.xlu0 %v1507_v57  ;;  %v1497_v29 = vshll.u32 %v1496_v16, 16 }
 0x648   : > { %v1304_v31 = vpop.xlane.xlu1 %1303 }
 0x649   : > { %v1305_v37 = vcvt.f32.s32 %v1304_v31  ;;  %v1482_v31 = vshll.u32 %v1481_v10, 16 }
 0x64a   : > { %v1290_v45 = vpop.xlane.xlu0 %1289 }
 0x64b   : > { %v1291_v48 = vcvt.f32.s32 %v1290_v45  ;;  %v1308_v35 = vadd.s32 %v1307_v59, %v1305_v37  ;;  %v1320_v59 = vcvt.f32.s32 %v3803_v44 }
 0x64c   : > { %v1360_v38 = vpop.xlane.xlu1 %1359 }
 0x64d   : > { %v1361_v50 = vcvt.f32.s32 %v1360_v38  ;;  %v1294_v14 = vadd.s32 %v1293_v7, %v1291_v48  ;;  %v1526_v7 = vcvt.f32.s32 %v3829_v49 }
 0x64e   : > { %v1346_v30 = vpop.xlane.xlu0 %1345 }
 0x64f   : > { %v1347_v15 = vcvt.f32.s32 %v1346_v30  ;;  %v1364_v45 = vadd.s32 %v1363_v24, %v1361_v50 }
 0x651   : > { %v1434_v4 = vpop.xlane.xlu1 %1433  ;;  %v1350_v53 = vadd.s32 %v1349_v54, %v1347_v15 }
 0x652   : > { %v1435_v22 = vcvt.f32.s32 %v1434_v4  ;;  %v1466_v4 = vcvt.f32.s32 %v3819_v40  ;;  %v1511_v40 = vcvt.f32.s32 %v3833_v20 }
 0x653   : > { %v1419_v0 = vpop.xlane.xlu0 %1418 }
 0x654   : > { %v1438_v46 = vadd.s32 %v1437_v33, %v1435_v22  ;;  %v1420_v43 = vcvt.f32.s32 %v1419_v0  ;;  %v1390_v22 = vcvt.f32.s32 %v3809_v41  ;;  %v1467_v0 = vshll.u32 %v1466_v4, 16 }
 0x655   : > { %v1494_v21 = vpop.xlane.xlu1 %1493  ;;  %v1527_v41 = vshll.u32 %v1526_v7, 16  ;;  %v1512_v54 = vshll.u32 %v1511_v40, 16 }
 0x656   : > { %v1423_v2 = vadd.s32 %v1422_v60, %v1420_v43  ;;  %v1495_v57 = vcvt.f32.s32 %v1494_v21  ;;  %v1546_v27 = vsel %vm1530_vm11, %v1438_v46, %v1308_v35  ;;  %v1321_v35 = vshll.u32 %v1320_v59, 16 }
 0x657   : > { %v1479_v38 = vpop.xlane.xlu0 %1478  ;;  %vm1571_vm10 = vcmp.eq.s32.totalorder %v2593_v39, %v1546_v27  ;;  %1563 = vst.msk [vmem:[%s2372_s12 + $0x8] sm:$0xff] %vm1553_vm6, %v1546_v27  ;;  %vm1587_vm9 = vcmp.eq.s32.totalorder %v2486_v52, %v1546_v27 }
 0x658   : > { %v1498_v32 = vadd.s32 %v1497_v29, %v1495_v57  ;;  %v1480_v47 = vcvt.f32.s32 %v1479_v38  ;;  %v3852_v30 = vsel %vm1571_vm10, -inf, %v3372_v11  ;;  %v1545_v17 = vsel %vm1529_vm8, %v1423_v2, %v1294_v14 }
 0x659   : > { %1604 = vmax.xlane.f32.xlu1 %v3852_v30  ;;  %vm1570_vm11 = vcmp.eq.s32.totalorder %v2593_v39, %v1545_v17  ;;  %1562 = vst.msk [vmem:[%s2372_s12] sm:$0xff] %vm1553_vm6, %v1545_v17  ;;  %vm1586_vm5 = vcmp.eq.s32.totalorder %v2496_v55, %v1545_v17  ;;  %v3884_v56 = vsel %vm1587_vm9, -inf, %v3404_v63  ;;  %v1391_v29 = vshll.u32 %v1390_v22, 16 }
 0x65a   : > { %v1483_v26 = vadd.s32 %v1482_v31, %v1480_v47  ;;  %v3862_v23 = vsel %vm1570_vm11, -inf, %v3382_v62  ;;  %v1550_v11 = vsel %vm1534_vm15, %v1498_v32, %v1364_v45  ;;  %v1621_v28 = vsel %vm486_vm2, %v3884_v56, -inf  ;;  %v4550_v45 = vld [vmem:[#allocation12_spill] sm:$0xff]  ;;  %v4551_v47 = vld [vmem:[#allocation14_spill] sm:$0xff] }
 0x65b   : > { %1602 = vmax.xlane.f32.xlu0 %v3862_v23  ;;  %vm1575_vm8 = vcmp.eq.s32.totalorder %v2593_v39, %v1550_v11  ;;  %1567 = vst.msk [vmem:[%s2372_s12 + $0x28] sm:$0xff] %vm1553_vm6, %v1550_v11  ;;  %vm1591_vm12 = vcmp.eq.s32.totalorder %v2536_v6, %v1550_v11 }
 0x65c   : > { %v3873_v13 = vsel %vm1575_vm8, -inf, %v3393_v1  ;;  %v1549_v62 = vsel %vm1533_vm7, %v1483_v26, %v1350_v53  ;;  %v3892_v1 = vsel %vm1586_vm5, -inf, %v3412_v58  ;;  %v3898_v19 = vsel %vm1591_vm12, -inf, %v3418_v51 }
 0x65d   : > { %1612 = vmax.xlane.f32.xlu1 %v3873_v13  ;;  %vm1574_vm15 = vcmp.eq.s32.totalorder %v2593_v39, %v1549_v62  ;;  %1566 = vst.msk [vmem:[%s2372_s12 + $0x20] sm:$0xff] %vm1553_vm6, %v1549_v62  ;;  %vm1590_vm7 = vcmp.eq.s32.totalorder %v2543_v8, %v1549_v62  ;;  %v1618_v63 = vsel %vm486_vm2, %v3892_v1, -inf  ;;  %v1633_v58 = vsel %vm486_vm2, %v3898_v19, -inf  ;;  %v4554_v62 = vld [vmem:[#allocation22_spill] sm:$0xff] }
 0x65e   : > { %v3887_v12 = vsel %vm1574_vm15, -inf, %v3407_v61  ;;  %v3903_v61 = vsel %vm1590_vm7, -inf, %v3423_v25  ;;  %v1334_v51 = vcvt.f32.s32 %v3799_v9  ;;  %v1451_v25 = vcvt.f32.s32 %v3824_v34 }
 0x65f   : > { %1610 = vmax.xlane.f32.xlu0 %v3887_v12  ;;  %v1630_v36 = vsel %vm486_vm2, %v3903_v61, -inf  ;;  %v1332_v37 = vpop.xlane.xlu1 %1331  ;;  %v1376_v9 = vcvt.f32.s32 %v3814_v5  ;;  %vm1930_vm15 = vcmask 31768  }
 0x660   : > { %v1333_v48 = vcvt.f32.s32 %v1332_v37  ;;  %v1335_v50 = vshll.u32 %v1334_v51, 16  ;;  %v1452_v44 = vshll.u32 %v1451_v25, 16  ;;  %v4556_v37 = vld [vmem:[#allocation5_spill] sm:$0xff] }
 0x661   : > { %1622 = vmax.xlane.f32.xlu1 %v1621_v28  ;;  %v1318_v3 = vpop.xlane.xlu0 %1317  ;;  %v1377_v20 = vshll.u32 %v1376_v9, 16 }
 0x662   : > { %v1319_v42 = vcvt.f32.s32 %v1318_v3  ;;  %v1336_v43 = vadd.s32 %v1335_v50, %v1333_v48  ;;  %v4560_v48 = vld [vmem:[#allocation18_spill] sm:$0xff] }
 0x663   : > { %1619 = vmax.xlane.f32.xlu0 %v1618_v63  ;;  %v4555_v63 = vld [vmem:[#allocation15_spill] sm:$0xff] }
 0x664   : > { %v1322_v15 = vadd.s32 %v1321_v35, %v1319_v42  ;;  %v4565_v35 = vld [vmem:[#allocation9_spill] sm:$0xff] }
 0x665   : > { %1634 = vmax.xlane.f32.xlu1 %v1633_v58 }
 0x667   : > { %1631 = vmax.xlane.f32.xlu0 %v1630_v36 }
 0x66b   : > { %v1388_v16 = vpop.xlane.xlu1 %1387 }
 0x66c   : > { %v1389_v49 = vcvt.f32.s32 %v1388_v16  ;;  %v4557_v16 = vld [vmem:[#allocation13_spill] sm:$0xff] }
 0x66d   : > { %v1374_v33 = vpop.xlane.xlu0 %1373 }
 0x66e   : > { %v1375_v14 = vcvt.f32.s32 %v1374_v33  ;;  %v1392_v11 = vadd.s32 %v1391_v29, %v1389_v49 }
 0x66f   : > { %v1464_v10 = vpop.xlane.xlu1 %1463 }
 0x670   : > { %v1465_v60 = vcvt.f32.s32 %v1464_v10  ;;  %v1378_v58 = vadd.s32 %v1377_v20, %v1375_v14  ;;  %v4563_v10 = vld [vmem:[#allocation4_spill] sm:$0xff] }
 0x671   : > { %v1449_v46 = vpop.xlane.xlu0 %1448 }
 0x672   : > { %v1468_v34 = vadd.s32 %v1467_v0, %v1465_v60  ;;  %v1450_v24 = vcvt.f32.s32 %v1449_v46  ;;  %v4564_v0 = vld [vmem:[#allocation20_spill] sm:$0xff] }
 0x673   : > { %v1524_v21 = vpop.xlane.xlu1 %1523 }
 0x674   : > { %v1453_v2 = vadd.s32 %v1452_v44, %v1450_v24  ;;  %v1525_v57 = vcvt.f32.s32 %v1524_v21  ;;  %v1548_v5 = vsel %vm1532_vm1, %v1468_v34, %v1336_v43  ;;  %v4566_v44 = vld [vmem:[#allocation3_spill] sm:$0xff]  ;;  %v4567_v34 = vld [vmem:[#allocation8_spill] sm:$0xff] }
 0x675   : > { %v1509_v31 = vpop.xlane.xlu0 %1508  ;;  %vm1573_vm3 = vcmp.eq.s32.totalorder %v2593_v39, %v1548_v5  ;;  %1565 = vst.msk [vmem:[%s2372_s12 + $0x18] sm:$0xff] %vm1553_vm6, %v1548_v5  ;;  %vm1589_vm4 = vcmp.eq.s32.totalorder %v4550_v45, %v1548_v5 }
 0x676   : > { %v1528_v38 = vadd.s32 %v1527_v41, %v1525_v57  ;;  %v1510_v32 = vcvt.f32.s32 %v1509_v31  ;;  %v3925_v17 = vsel %vm1573_vm3, -inf, %v4551_v47  ;;  %v1547_v18 = vsel %vm1531_vm13, %v1453_v2, %v1322_v15 }
 0x677   : > { %1608 = vmax.xlane.f32.xlu1 %v3925_v17  ;;  %vm1572_vm1 = vcmp.eq.s32.totalorder %v2593_v39, %v1547_v18  ;;  %1564 = vst.msk [vmem:[%s2372_s12 + $0x10] sm:$0xff] %vm1553_vm6, %v1547_v18  ;;  %v3935_v28 = vsel %vm1589_vm4, -inf, %v4554_v62  ;;  %vm1588_vm10 = vcmp.eq.s32.totalorder %v4555_v63, %v1547_v18 }
 0x678   : > { %v1513_v36 = vadd.s32 %v1512_v54, %v1510_v32  ;;  %v3939_v3 = vsel %vm1572_vm1, -inf, %v4556_v37  ;;  %v3943_v51 = vsel %vm1588_vm10, -inf, %v4557_v16  ;;  %v1552_v33 = vsel %vm1536_vm0, %v1528_v38, %v1392_v11 }
 0x679   : > { %1606 = vmax.xlane.f32.xlu0 %v3939_v3  ;;  %v1627_v25 = vsel %vm486_vm2, %v3935_v28, -inf  ;;  %vm1593_vm13 = vcmp.eq.s32.totalorder %v4560_v48, %v1552_v33  ;;  %1569 = vst.msk [vmem:[%s2372_s12 + $0x38] sm:$0xff] %vm1553_vm6, %v1552_v33  ;;  %v1624_v60 = vsel %vm486_vm2, %v3943_v51, -inf  ;;  %vm1577_vm0 = vcmp.eq.s32.totalorder %v2593_v39, %v1552_v33 }
 0x67a   : > { %v1551_v42 = vsel %vm1535_vm14, %v1513_v36, %v1378_v58  ;;  %v3957_v50 = vsel %vm1593_vm13, -inf, %v4563_v10  ;;  %v3974_v43 = vsel %vm1577_vm0, -inf, %v4566_v44 }
 0x67b   : > { %1628 = vmax.xlane.f32.xlu1 %v1627_v25  ;;  %vm1592_vm11 = vcmp.eq.s32.totalorder %v4564_v0, %v1551_v42  ;;  %1568 = vst.msk [vmem:[%s2372_s12 + $0x30] sm:$0xff] %vm1553_vm6, %v1551_v42  ;;  %v1639_v40 = vsel %vm486_vm2, %v3957_v50, -inf  ;;  %vm1576_vm14 = vcmp.eq.s32.totalorder %v2593_v39, %v1551_v42 }
 0x67c   : > { %v3965_v9 = vsel %vm1592_vm11, -inf, %v4565_v35  ;;  %v3978_v24 = vsel %vm1576_vm14, -inf, %v4567_v34 }
 0x67d   : > { %1625 = vmax.xlane.f32.xlu0 %v1624_v60  ;;  %v1636_v46 = vsel %vm486_vm2, %v3965_v9, -inf }
 0x67f   : > { %1640 = vmax.xlane.f32.xlu1 %v1639_v40 }
 0x681   : > { %1637 = vmax.xlane.f32.xlu0 %v1636_v46 }
 0x683   : > { %1616 = vmax.xlane.f32.xlu1 %v3974_v43 }
 0x685   : > { %1614 = vmax.xlane.f32.xlu0 %v3978_v24 }
 0x6e6   : > { %v3981_v29 = vpop.xlane.xlu1 %1604 }
 0x6e7   : > { %vm1643_vm6 = vcmp.eq.f32.partialorder %v3852_v30, %v3981_v29 }
 0x6e8   : > { %v3986_v41 = vsel %vm1643_vm6, %v2593_v39, 2147483647  ;;  %v3988_v15 = vpop.xlane.xlu0 %1602 }
 0x6e9   : > { %vm1642_vm9 = vcmp.eq.f32.partialorder %v3862_v23, %v3988_v15  ;;  %v1673_v49 = vshra.s32 %v3986_v41, 16 }
 0x6ea   : > { %v3994_v21 = vsel %vm1642_vm9, %v2593_v39, 2147483647  ;;  %v3996_v14 = vpop.xlane.xlu1 %1612 }
 0x6eb   : > { %vm1647_vm8 = vcmp.eq.f32.partialorder %v3873_v13, %v3996_v14  ;;  %v4000_v2 = vcvt.s32.f32 %v1673_v49  ;;  %v1659_v30 = vshra.s32 %v3994_v21, 16 }
 0x6ec   : > { %v4004_v57 = vsel %vm1647_vm8, %v2593_v39, 2147483647  ;;  %v4006_v27 = vpop.xlane.xlu0 %1610 }
 0x6ed   : > { %vm1646_vm5 = vcmp.eq.f32.partialorder %v3887_v12, %v4006_v27  ;;  %1676 = vmin.xlane.f32.xlu1 %v4000_v2  ;;  %v4011_v23 = vcvt.s32.f32 %v1659_v30  ;;  %v1729_v5 = vshra.s32 %v4004_v57, 16 }
 0x6ee   : > { %v4015_v13 = vsel %vm1646_vm5, %v2593_v39, 2147483647  ;;  %v4017_v20 = vpop.xlane.xlu1 %1622 }
 0x6ef   : > { %vm1771_vm12 = vcmp.eq.f32.partialorder %v3884_v56, %v4017_v20  ;;  %vm1907_vm7 = vcmp.ge.f32.partialorder %v4017_v20, %v3981_v29  ;;  %1662 = vmin.xlane.f32.xlu0 %v4011_v23  ;;  %v4024_v12 = vcvt.s32.f32 %v1729_v5  ;;  %v1715_v54 = vshra.s32 %v4015_v13, 16 }
 0x6f0   : > { %v1779_v31 = vsel %vm1771_vm12, %v2486_v52, 2147483647  ;;  %v1915_v38 = vsel %vm1907_vm7, %v4017_v20, %v3981_v29  ;;  %v4033_v32 = vpop.xlane.xlu0 %1619 }
 0x6f1   : > { %1932 = vst.msk [vmem:[%s2367_s24 + $0x8] sm:$0xff] %vm1930_vm15, %v1915_v38  ;;  %vm1770_vm3 = vcmp.eq.f32.partialorder %v3892_v1, %v4033_v32  ;;  %vm1906_vm4 = vcmp.ge.f32.partialorder %v4033_v32, %v3988_v15  ;;  %1732 = vmin.xlane.f32.xlu1 %v4024_v12  ;;  %v4042_v56 = vcvt.s32.f32 %v1715_v54  ;;  %v4045_v52 = vsel %vm486_vm2, %v1779_v31, 2147483647 }
 0x6f2   : > { %v1778_v47 = vsel %vm1770_vm3, %v2496_v55, 2147483647  ;;  %v1914_v53 = vsel %vm1906_vm4, %v4033_v32, %v3988_v15  ;;  %v4053_v1 = vpop.xlane.xlu1 %1634  ;;  %v1803_v26 = vshra.s32 %v4045_v52, 16 }
 0x6f3   : > { %1931 = vst.msk [vmem:[%s2367_s24] sm:$0xff] %vm1930_vm15, %v1914_v53  ;;  %vm1775_vm1 = vcmp.eq.f32.partialorder %v3898_v19, %v4053_v1  ;;  %vm1911_vm10 = vcmp.ge.f32.partialorder %v4053_v1, %v3996_v14  ;;  %1718 = vmin.xlane.f32.xlu0 %v4042_v56  ;;  %v4064_v55 = vsel %vm486_vm2, %v1778_v47, 2147483647 }
 0x6f4   : > { %v1783_v18 = vsel %vm1775_vm1, %v2536_v6, 2147483647  ;;  %v1919_v11 = vsel %vm1911_vm10, %v4053_v1, %v3996_v14  ;;  %v4072_v62 = vpop.xlane.xlu0 %1631  ;;  %v4074_v19 = vcvt.s32.f32 %v1803_v26  ;;  %v1788_v58 = vshra.s32 %v4064_v55, 16 }
 0x6f5   : > { %1936 = vst.msk [vmem:[%s2367_s24 + $0x28] sm:$0xff] %vm1930_vm15, %v1919_v11  ;;  %vm1774_vm13 = vcmp.eq.f32.partialorder %v3903_v61, %v4072_v62  ;;  %vm1910_vm11 = vcmp.ge.f32.partialorder %v4072_v62, %v4006_v27  ;;  %v4084_v6 = vsel %vm486_vm2, %v1783_v18, 2147483647 }
 0x6f6   : > { %v1782_v36 = vsel %vm1774_vm13, %v2543_v8, 2147483647  ;;  %v1918_v37 = vsel %vm1910_vm11, %v4072_v62, %v4006_v27  ;;  %1806 = vmin.xlane.f32.xlu1 %v4074_v19  ;;  %v4093_v16 = vcvt.s32.f32 %v1788_v58  ;;  %v1863_v61 = vshra.s32 %v4084_v6, 16 }
 0x6f7   : > { %1935 = vst.msk [vmem:[%s2367_s24 + $0x20] sm:$0xff] %vm1930_vm15, %v1918_v37  ;;  %v4099_v4 = vsel %vm486_vm2, %v1782_v36, 2147483647 }
 0x6f8   : > { %1791 = vmin.xlane.f32.xlu0 %v4093_v16  ;;  %v4102_v8 = vcvt.s32.f32 %v1863_v61  ;;  %v1848_v59 = vshra.s32 %v4099_v4, 16 }
 0x6fa   : > { %1866 = vmin.xlane.f32.xlu1 %v4102_v8  ;;  %v4106_v33 = vcvt.s32.f32 %v1848_v59 }
 0x6fc   : > { %1851 = vmin.xlane.f32.xlu0 %v4106_v33 }
 0x704   : > { %v4109_v25 = vpop.xlane.xlu1 %1608 }
 0x705   : > { %vm1645_vm0 = vcmp.eq.f32.partialorder %v3925_v17, %v4109_v25 }
 0x706   : > { %v4114_v22 = vsel %vm1645_vm0, %v2593_v39, 2147483647  ;;  %v4116_v7 = vpop.xlane.xlu0 %1606 }
 0x707   : > { %vm1644_vm14 = vcmp.eq.f32.partialorder %v3939_v3, %v4116_v7  ;;  %v1701_v42 = vshra.s32 %v4114_v22, 16 }
 0x708   : > { %v4122_v10 = vsel %vm1644_vm14, %v2593_v39, 2147483647  ;;  %v4124_v60 = vpop.xlane.xlu1 %1628 }
 0x709   : > { %vm1909_vm6 = vcmp.ge.f32.partialorder %v4124_v60, %v4109_v25  ;;  %v4128_v17 = vcvt.s32.f32 %v1701_v42  ;;  %v1687_v35 = vshra.s32 %v4122_v10, 16  ;;  %vm1773_vm8 = vcmp.eq.f32.partialorder %v3935_v28, %v4124_v60 }
 0x70a   : > { %v1917_v3 = vsel %vm1909_vm6, %v4124_v60, %v4109_v25  ;;  %v4136_v40 = vpop.xlane.xlu0 %1625  ;;  %v1781_v28 = vsel %vm1773_vm8, %v4550_v45, 2147483647  ;;  %v1672_v42 = vand.u32 65535, %v3986_v41 }
 0x70b   : > { %1934 = vst.msk [vmem:[%s2367_s24 + $0x18] sm:$0xff] %vm1930_vm15, %v1917_v3  ;;  %vm1908_vm9 = vcmp.ge.f32.partialorder %v4136_v40, %v4116_v7  ;;  %1704 = vmin.xlane.f32.xlu1 %v4128_v17  ;;  %v4143_v46 = vcvt.s32.f32 %v1687_v35  ;;  %vm1772_vm5 = vcmp.eq.f32.partialorder %v3943_v51, %v4136_v40  ;;  %v1658_v35 = vand.u32 65535, %v3994_v21 }
 0x70c   : > { %v1916_v44 = vsel %vm1908_vm9, %v4136_v40, %v4116_v7  ;;  %v4152_v34 = vpop.xlane.xlu1 %1640  ;;  %v1780_v5 = vsel %vm1772_vm5, %v4555_v63, 2147483647 }
 0x70d   : > { %1933 = vst.msk [vmem:[%s2367_s24 + $0x10] sm:$0xff] %vm1930_vm15, %v1916_v44  ;;  %1690 = vmin.xlane.f32.xlu0 %v4143_v46  ;;  %vm1777_vm12 = vcmp.eq.f32.partialorder %v3957_v50, %v4152_v34  ;;  %v4184_v50 = vsel %vm486_vm2, %v1781_v28, 2147483647  ;;  %v1674_v44 = vcvt.s32.f32 %v1672_v42  ;;  %v1728_v28 = vand.u32 65535, %v4004_v57 }
 0x70e   : > { %v4159_v49 = vpop.xlane.xlu0 %1637  ;;  %v1847_v42 = vand.u32 65535, %v4099_v4 }
 0x70f   : > { %vm1776_vm13 = vcmp.eq.f32.partialorder %v3965_v9, %v4159_v49 }
 0x710   : > { %v4164_v30 = vpop.xlane.xlu1 %1616  ;;  %v1784_v38 = vsel %vm1776_vm13, %v4564_v0, 2147483647 }
 0x711   : > { %vm1649_vm3 = vcmp.eq.f32.partialorder %v3974_v43, %v4164_v30  ;;  %vm1913_vm1 = vcmp.ge.f32.partialorder %v4152_v34, %v4164_v30  ;;  %v1785_v43 = vsel %vm1777_vm12, %v4560_v48, 2147483647  ;;  %v4203_v48 = vsel %vm486_vm2, %v1780_v5, 2147483647 }
 0x712   : > { %v4174_v51 = vsel %vm1649_vm3, %v2593_v39, 2147483647  ;;  %v1921_v45 = vsel %vm1913_vm1, %v4152_v34, %v4164_v30  ;;  %v4181_v63 = vpop.xlane.xlu0 %1614  ;;  %v4213_v53 = vsel %vm486_vm2, %v1785_v43, 2147483647  ;;  %v1818_v18 = vshra.s32 %v4203_v48, 16 }
 0x713   : > { %1938 = vst.msk [vmem:[%s2367_s24 + $0x38] sm:$0xff] %vm1930_vm15, %v1921_v45  ;;  %vm1648_vm0 = vcmp.eq.f32.partialorder %v3978_v24, %v4181_v63  ;;  %vm1912_vm14 = vcmp.ge.f32.partialorder %v4159_v49, %v4181_v63  ;;  %v1757_v9 = vshra.s32 %v4174_v51, 16  ;;  %v4220_v11 = vsel %vm486_vm2, %v1784_v38, 2147483647 }
 0x714   : > { %v4195_v54 = vsel %vm1648_vm0, %v2593_v39, 2147483647  ;;  %v1920_v31 = vsel %vm1912_vm14, %v4159_v49, %v4181_v63  ;;  %v1833_v39 = vshra.s32 %v4184_v50, 16  ;;  %v1893_v58 = vshra.s32 %v4213_v53, 16 }
 0x715   : > { %1937 = vst.msk [vmem:[%s2367_s24 + $0x30] sm:$0xff] %vm1930_vm15, %v1920_v31  ;;  %v4208_v24 = vcvt.s32.f32 %v1757_v9  ;;  %v1743_v47 = vshra.s32 %v4195_v54, 16  ;;  %v4227_v36 = vcvt.s32.f32 %v1818_v18  ;;  %v1878_v37 = vshra.s32 %v4220_v11, 16 }
 0x716   : > { %v4223_v0 = vcvt.s32.f32 %v1833_v39  ;;  %v4231_v61 = vcvt.s32.f32 %v1893_v58  ;;  %v1660_v43 = vcvt.s32.f32 %v1658_v35  ;;  %v1714_v9 = vand.u32 65535, %v4015_v13 }
 0x717   : > { %1760 = vmin.xlane.f32.xlu1 %v4208_v24  ;;  %v4216_v26 = vcvt.s32.f32 %v1743_v47  ;;  %v4234_v59 = vcvt.s32.f32 %v1878_v37  ;;  %v1730_v31 = vcvt.s32.f32 %v1728_v28  ;;  %v1686_v28 = vand.u32 65535, %v4122_v10 }
 0x718   : > { %v1716_v47 = vcvt.s32.f32 %v1714_v9  ;;  %v1742_v10 = vand.u32 65535, %v4195_v54 }
 0x719   : > { %1746 = vmin.xlane.f32.xlu0 %v4216_v26 }
 0x71b   : > { %1836 = vmin.xlane.f32.xlu1 %v4223_v0 }
 0x71d   : > { %1821 = vmin.xlane.f32.xlu0 %v4227_v36 }
 0x71f   : > { %1896 = vmin.xlane.f32.xlu1 %v4231_v61 }
 0x721   : > { %1881 = vmin.xlane.f32.xlu0 %v4234_v59 }
 0x77a   : > { %v4239_v3 = vpop.xlane.xlu1 %1676 }
 0x77b   : > { %vm1678_vm2 = vcmp.eq.f32.partialorder %v4000_v2, %v4239_v3  ;;  %v1802_v2 = vand.u32 65535, %v4045_v52 }
 0x77c   : > { %v4244_v5 = vpop.xlane.xlu0 %1662  ;;  %v1679_v45 = vsel %vm1678_vm2, %v1674_v44, inf  ;;  %v1849_v44 = vcvt.s32.f32 %v1847_v42 }
 0x77d   : > { %vm1664_vm8 = vcmp.eq.f32.partialorder %v4011_v23, %v4244_v5  ;;  %1680 = vmin.xlane.f32.xlu1 %v1679_v45  ;;  %v1787_v23 = vand.u32 65535, %v4064_v55  ;;  %v1804_v18 = vcvt.s32.f32 %v1802_v2 }
 0x77e   : > { %v4249_v41 = vpop.xlane.xlu1 %1732  ;;  %v1665_v21 = vsel %vm1664_vm8, %v1660_v43, inf }
 0x77f   : > { %vm1734_vm5 = vcmp.eq.f32.partialorder %v4024_v12, %v4249_v41  ;;  %1666 = vmin.xlane.f32.xlu0 %v1665_v21  ;;  %v1862_v12 = vand.u32 65535, %v4084_v6  ;;  %v1789_v37 = vcvt.s32.f32 %v1787_v23  ;;  %v1688_v21 = vcvt.s32.f32 %v1686_v28 }
 0x780   : > { %v4254_v57 = vpop.xlane.xlu0 %1718  ;;  %v1735_v38 = vsel %vm1734_vm5, %v1730_v31, inf  ;;  %v1744_v23 = vcvt.s32.f32 %v1742_v10 }
 0x781   : > { %vm1720_vm12 = vcmp.eq.f32.partialorder %v4042_v56, %v4254_v57  ;;  %1736 = vmin.xlane.f32.xlu1 %v1735_v38  ;;  %v1864_v35 = vcvt.s32.f32 %v1862_v12  ;;  %v1832_v38 = vand.u32 65535, %v4184_v50 }
 0x782   : > { %v1721_v13 = vsel %vm1720_vm12, %v1716_v47, inf }
 0x783   : > { %1722 = vmin.xlane.f32.xlu0 %v1721_v13  ;;  %v4259_v39 = vpop.xlane.xlu1 %1806  ;;  %v1834_v13 = vcvt.s32.f32 %v1832_v38 }
 0x784   : > { %vm1808_vm3 = vcmp.eq.f32.partialorder %v4074_v19, %v4259_v39 }
 0x785   : > { %v4264_v52 = vpop.xlane.xlu0 %1791  ;;  %v1809_v58 = vsel %vm1808_vm3, %v1804_v18, inf  ;;  %v1892_v18 = vand.u32 65535, %v4213_v53 }
 0x786   : > { %vm1793_vm13 = vcmp.eq.f32.partialorder %v4093_v16, %v4264_v52  ;;  %1810 = vmin.xlane.f32.xlu1 %v1809_v58  ;;  %v1700_v16 = vand.u32 65535, %v4114_v22  ;;  %v1756_v22 = vand.u32 65535, %v4174_v51 }
 0x787   : > { %v4269_v56 = vpop.xlane.xlu1 %1866  ;;  %v1794_v55 = vsel %vm1793_vm13, %v1789_v37, inf  ;;  %v1894_v37 = vcvt.s32.f32 %v1892_v18 }
 0x788   : > { %vm1868_vm0 = vcmp.eq.f32.partialorder %v4102_v8, %v4269_v56  ;;  %1795 = vmin.xlane.f32.xlu0 %v1794_v55  ;;  %v1702_v43 = vcvt.s32.f32 %v1700_v16  ;;  %v1758_v2 = vcvt.s32.f32 %v1756_v22  ;;  %v1798_v16 = vcvt.f32.s32 %v4264_v52 }
 0x789   : > { %v4273_v6 = vpop.xlane.xlu0 %1851  ;;  %v1869_v19 = vsel %vm1868_vm0, %v1864_v35, inf }
 0x78a   : > { %vm1853_vm2 = vcmp.eq.f32.partialorder %v4106_v33, %v4273_v6  ;;  %1870 = vmin.xlane.f32.xlu1 %v1869_v19  ;;  %v1683_v19 = vcvt.f32.s32 %v4239_v3  ;;  %v1725_v3 = vcvt.f32.s32 %v4254_v57  ;;  %v1799_v38 = vshll.u32 %v1798_v16, 16 }
 0x78b   : > { %v1854_v4 = vsel %vm1853_vm2, %v1849_v44, inf  ;;  %v1813_v44 = vcvt.f32.s32 %v4259_v39  ;;  %v1858_v39 = vcvt.f32.s32 %v4273_v6 }
 0x78c   : > { %1855 = vmin.xlane.f32.xlu0 %v1854_v4 }
 0x78d   : > { %v1814_v22 = vshll.u32 %v1813_v44, 16 }
 0x798   : > { %v4279_v45 = vpop.xlane.xlu1 %1704 }
 0x799   : > { %vm1706_vm8 = vcmp.eq.f32.partialorder %v4128_v17, %v4279_v45 }
 0x79a   : > { %v4283_v8 = vpop.xlane.xlu0 %1690  ;;  %v1707_v9 = vsel %vm1706_vm8, %v1702_v43, inf  ;;  %v1739_v43 = vcvt.f32.s32 %v4249_v41 }
 0x79b   : > { %vm1692_vm5 = vcmp.eq.f32.partialorder %v4143_v46, %v4283_v8  ;;  %1708 = vmin.xlane.f32.xlu1 %v1707_v9  ;;  %v1817_v46 = vand.u32 65535, %v4203_v48  ;;  %v1877_v48 = vand.u32 65535, %v4220_v11 }
 0x79c   : > { %v1693_v33 = vsel %vm1692_vm5, %v1688_v21, inf  ;;  %v1740_v41 = vshll.u32 %v1739_v43, 16 }
 0x79d   : > { %1694 = vmin.xlane.f32.xlu0 %v1693_v33  ;;  %v1819_v12 = vcvt.s32.f32 %v1817_v46  ;;  %v1879_v42 = vcvt.s32.f32 %v1877_v48  ;;  %v1684_v33 = vshll.u32 %v1683_v19, 16  ;;  %v1859_v48 = vshll.u32 %v1858_v39, 16 }
 0x79e   : > { %v1711_v19 = vcvt.f32.s32 %v4279_v45 }
 0x7a0   : > { %v1712_v43 = vshll.u32 %v1711_v19, 16 }
 0x7a4   : > { %v4289_v31 = vpop.xlane.xlu1 %1760 }
 0x7a5   : > { %vm1762_vm12 = vcmp.eq.f32.partialorder %v4208_v24, %v4289_v31  ;;  %v1767_v16 = vcvt.f32.s32 %v4289_v31 }
 0x7a6   : > { %v4294_v17 = vpop.xlane.xlu0 %1746  ;;  %v1763_v47 = vsel %vm1762_vm12, %v1758_v2, inf }
 0x7a7   : > { %vm1748_vm3 = vcmp.eq.f32.partialorder %v4216_v26, %v4294_v17  ;;  %1764 = vmin.xlane.f32.xlu1 %v1763_v47  ;;  %v1753_v45 = vcvt.f32.s32 %v4294_v17  ;;  %v1768_v31 = vshll.u32 %v1767_v16, 16 }
 0x7a8   : > { %v4299_v51 = vpop.xlane.xlu1 %1836  ;;  %v1749_v54 = vsel %vm1748_vm3, %v1744_v23, inf }
 0x7a9   : > { %vm1838_vm13 = vcmp.eq.f32.partialorder %v4223_v0, %v4299_v51  ;;  %1750 = vmin.xlane.f32.xlu0 %v1749_v54  ;;  %v1843_v44 = vcvt.f32.s32 %v4299_v51 }
 0x7aa   : > { %v4304_v50 = vpop.xlane.xlu0 %1821  ;;  %v1839_v24 = vsel %vm1838_vm13, %v1834_v13, inf }
 0x7ab   : > { %vm1823_vm0 = vcmp.eq.f32.partialorder %v4227_v36, %v4304_v50  ;;  %1840 = vmin.xlane.f32.xlu1 %v1839_v24  ;;  %v1828_v14 = vcvt.f32.s32 %v4304_v50 }
 0x7ac   : > { %v4309_v26 = vpop.xlane.xlu1 %1896  ;;  %v1824_v58 = vsel %vm1823_vm0, %v1819_v12, inf  ;;  %v1726_v12 = vshll.u32 %v1725_v3, 16 }
 0x7ad   : > { %vm1898_vm2 = vcmp.eq.f32.partialorder %v4231_v61, %v4309_v26  ;;  %1825 = vmin.xlane.f32.xlu0 %v1824_v58  ;;  %v1669_v61 = vcvt.f32.s32 %v4244_v5  ;;  %v1903_v27 = vcvt.f32.s32 %v4309_v26 }
 0x7ae   : > { %v4313_v53 = vpop.xlane.xlu0 %1881  ;;  %v1899_v0 = vsel %vm1898_vm2, %v1894_v37, inf }
 0x7af   : > { %vm1883_vm8 = vcmp.eq.f32.partialorder %v4234_v59, %v4313_v53  ;;  %1900 = vmin.xlane.f32.xlu1 %v1899_v0  ;;  %v1873_v59 = vcvt.f32.s32 %v4269_v56  ;;  %v1670_v2 = vshll.u32 %v1669_v61, 16  ;;  %v1888_v51 = vcvt.f32.s32 %v4313_v53 }
 0x7b0   : > { %v1884_v11 = vsel %vm1883_vm8, %v1879_v42, inf  ;;  %v1904_v26 = vshll.u32 %v1903_v27, 16 }
 0x7b1   : > { %1885 = vmin.xlane.f32.xlu0 %v1884_v11  ;;  %v1874_v56 = vshll.u32 %v1873_v59, 16  ;;  %v1844_v59 = vshll.u32 %v1843_v44, 16 }
 0x80a   : > { %v1681_v36 = vpop.xlane.xlu1 %1680 }
 0x80b   : > { %v1682_v28 = vcvt.f32.s32 %v1681_v36 }
 0x80c   : > { %v1667_v55 = vpop.xlane.xlu0 %1666 }
 0x80d   : > { %v1668_v9 = vcvt.f32.s32 %v1667_v55  ;;  %v1685_v47 = vadd.s32 %v1684_v33, %v1682_v28  ;;  %v1829_v33 = vshll.u32 %v1828_v14, 16 }
 0x80e   : > { %v1737_v35 = vpop.xlane.xlu1 %1736 }
 0x80f   : > { %v1738_v52 = vcvt.f32.s32 %v1737_v35  ;;  %v1671_v54 = vadd.s32 %v1670_v2, %v1668_v9 }
 0x810   : > { %v1723_v4 = vpop.xlane.xlu0 %1722 }
 0x811   : > { %v1724_v18 = vcvt.f32.s32 %v1723_v4  ;;  %v1741_v37 = vadd.s32 %v1740_v41, %v1738_v52  ;;  %v1697_v4 = vcvt.f32.s32 %v4283_v8  ;;  %v1889_v52 = vshll.u32 %v1888_v51, 16 }
 0x813   : > { %v1811_v21 = vpop.xlane.xlu1 %1810  ;;  %v1727_v29 = vadd.s32 %v1726_v12, %v1724_v18 }
 0x814   : > { %v1812_v10 = vcvt.f32.s32 %v1811_v21  ;;  %v1698_v21 = vshll.u32 %v1697_v4, 16 }
 0x815   : > { %v1796_v5 = vpop.xlane.xlu0 %1795 }
 0x816   : > { %v1815_v23 = vadd.s32 %v1814_v22, %v1812_v10  ;;  %v1797_v46 = vcvt.f32.s32 %v1796_v5 }
 0x817   : > { %v1871_v13 = vpop.xlane.xlu1 %1870 }
 0x818   : > { %v1923_v57 = vsel %vm1907_vm7, %v1815_v23, %v1685_v47  ;;  %v1800_v24 = vadd.s32 %v1799_v38, %v1797_v46  ;;  %v1872_v6 = vcvt.f32.s32 %v1871_v13  ;;  %v1754_v47 = vshll.u32 %v1753_v45, 16 }
 0x819   : > { %1940 = vst.msk [vmem:[%s2372_s12 + $0x8] sm:$0xff] %vm1930_vm15, %v1923_v57  ;;  %v1856_v58 = vpop.xlane.xlu0 %1855 }
 0x81a   : > { %v1922_v0 = vsel %vm1906_vm4, %v1800_v24, %v1671_v54  ;;  %v1875_v42 = vadd.s32 %v1874_v56, %v1872_v6  ;;  %v1857_v11 = vcvt.f32.s32 %v1856_v58 }
 0x81b   : > { %1939 = vst.msk [vmem:[%s2372_s12] sm:$0xff] %vm1930_vm15, %v1922_v0 }
 0x81c   : > { %v1927_v20 = vsel %vm1911_vm10, %v1875_v42, %v1741_v37  ;;  %v1860_v36 = vadd.s32 %v1859_v48, %v1857_v11 }
 0x81d   : > { %1944 = vst.msk [vmem:[%s2372_s12 + $0x28] sm:$0xff] %vm1930_vm15, %v1927_v20 }
 0x81e   : > { %v1926_v55 = vsel %vm1910_vm11, %v1860_v36, %v1727_v29 }
 0x81f   : > { %1943 = vst.msk [vmem:[%s2372_s12 + $0x20] sm:$0xff] %vm1930_vm15, %v1926_v55 }
 0x828   : > { %v1709_v15 = vpop.xlane.xlu1 %1708 }
 0x829   : > { %v1710_v61 = vcvt.f32.s32 %v1709_v15 }
 0x82a   : > { %v1695_v32 = vpop.xlane.xlu0 %1694 }
 0x82b   : > { %v1696_v62 = vcvt.f32.s32 %v1695_v32  ;;  %v1713_v50 = vadd.s32 %v1712_v43, %v1710_v61 }
 0x82d   : > { %v1699_v3 = vadd.s32 %v1698_v21, %v1696_v62 }
 0x834   : > { %v1765_v35 = vpop.xlane.xlu1 %1764 }
 0x835   : > { %v1766_v22 = vcvt.f32.s32 %v1765_v35 }
 0x836   : > { %v1751_v1 = vpop.xlane.xlu0 %1750 }
 0x837   : > { %v1752_v39 = vcvt.f32.s32 %v1751_v1  ;;  %v1769_v46 = vadd.s32 %v1768_v31, %v1766_v22 }
 0x838   : > { %v1841_v28 = vpop.xlane.xlu1 %1840 }
 0x839   : > { %v1842_v9 = vcvt.f32.s32 %v1841_v28  ;;  %v1755_v25 = vadd.s32 %v1754_v47, %v1752_v39 }
 0x83a   : > { %v1826_v8 = vpop.xlane.xlu0 %1825 }
 0x83b   : > { %v1845_v10 = vadd.s32 %v1844_v59, %v1842_v9  ;;  %v1827_v2 = vcvt.f32.s32 %v1826_v8 }
 0x83c   : > { %v1901_v38 = vpop.xlane.xlu1 %1900 }
 0x83d   : > { %v1925_v17 = vsel %vm1909_vm6, %v1845_v10, %v1713_v50  ;;  %v1830_v5 = vadd.s32 %v1829_v33, %v1827_v2  ;;  %v1902_v53 = vcvt.f32.s32 %v1901_v38 }
 0x83e   : > { %1942 = vst.msk [vmem:[%s2372_s12 + $0x18] sm:$0xff] %vm1930_vm15, %v1925_v17  ;;  %v1886_v23 = vpop.xlane.xlu0 %1885 }
 0x83f   : > { %v1924_v41 = vsel %vm1908_vm9, %v1830_v5, %v1699_v3  ;;  %v1905_v56 = vadd.s32 %v1904_v26, %v1902_v53  ;;  %v1887_v54 = vcvt.f32.s32 %v1886_v23 }
 0x840   : > { %1941 = vst.msk [vmem:[%s2372_s12 + $0x10] sm:$0xff] %vm1930_vm15, %v1924_v41 }
 0x841   : > { %v1929_v60 = vsel %vm1913_vm1, %v1905_v56, %v1769_v46  ;;  %v1890_v13 = vadd.s32 %v1889_v52, %v1887_v54 }
 0x842   : > { %1946 = vst.msk [vmem:[%s2372_s12 + $0x38] sm:$0xff] %vm1930_vm15, %v1929_v60 }
 0x843   : > { %v1928_v18 = vsel %vm1912_vm14, %v1890_v13, %v1755_v25 }
 0x844   : > { %1945 = vst.msk [vmem:[%s2372_s12 + $0x30] sm:$0xff] %vm1930_vm15, %v1928_v18 }
 0x845 PF: > { %s14_s18 = sadd.s32 1, %s2273_s18   ;;  %s4568_s12 = smov %s2253_s13 }
 0x846   : > { %p11_p12 = scmp.ge.s32.totalorder %s14_s18, 6   ;;  %s4569_s13 = smov %s2346_s23 }
 0x847   : > { %s4570_s14 = smov %s2265_s16  ;;  %s4571_s15 = smov %s2269_s17 }
 0x848   : > { %s4572_s16 = smov %s4575_s19  ;;  %s4573_s17 = smov %s4579_s20 }
 0x849   :  { %13 = sbr.rel (!%p11_p12) target bundleno = 4 (0x4), region = 120 }

</bundles_post_ra>
